<compile_context>
chip_gen: v7x
topology: tpu7x:2x2x1
jax: 0.10.0
libtpu: 0.0.40
codegen_flags: <defaults>
</compile_context>

<pallas_src>
import jax
import jax.numpy as jnp
import numpy as np
from jax.experimental import pallas as pl
from jax.experimental.pallas import tpu as pltpu


_BLOCK_B_MAX = 256          # per-branch batch-tile rows (2 branches/step => 512)


def _round_up(n, m):
    return ((n + m - 1) // m) * m


def _pick_block_b(batch):
    """Biggest useful batch tile: cap at _BLOCK_B_MAX so large batches span
    multiple grid steps (megacore), full (sublane-rounded) batch otherwise."""
    if batch >= _BLOCK_B_MAX:
        return _BLOCK_B_MAX
    return _round_up(max(batch, 1), 8)


def _pad_batch(x, bb):
    """Pad rows up to a multiple of bb (no-op / no copy when already aligned)."""
    pad = (-x.shape[0]) % bb
    if pad:
        x = jnp.concatenate(
            [x, jnp.zeros((pad,) + x.shape[1:], x.dtype)], axis=0)
    return x


# ----------------------------------------------------------------------------
# Fused embedding-net chain: 3 bf16 MXU matmuls (f32 accumulation) + VPU ReLUs.
# ----------------------------------------------------------------------------
def _mlp_chain(x, w1, b1, w2, b2, w3, b3):
    h = jnp.dot(x.astype(jnp.bfloat16), w1,
                preferred_element_type=jnp.float32) + b1          # (bb, H1) f32
    h = jnp.maximum(h, 0.0)
    h = jnp.dot(h.astype(jnp.bfloat16), w2,
                preferred_element_type=jnp.float32) + b2          # (bb, H2) f32
    h = jnp.maximum(h, 0.0)
    return jnp.dot(h.astype(jnp.bfloat16), w3,
                   preferred_element_type=jnp.float32) + b3       # (bb, E)  f32


def _siamese_kernel(x1_ref, x2_ref, w1_ref, b1_ref, w2_ref, b2_ref,
                    w3_ref, b3_ref, o1_ref, o2_ref):
    # Load shared weights once per grid step, use them for both branches.
    w1, b1 = w1_ref[...], b1_ref[...]
    w2, b2 = w2_ref[...], b2_ref[...]
    w3, b3 = w3_ref[...], b3_ref[...]
    o1_ref[...] = _mlp_chain(x1_ref[...], w1, b1, w2, b2, w3, b3
                             ).astype(o1_ref.dtype)
    o2_ref[...] = _mlp_chain(x2_ref[...], w1, b1, w2, b2, w3, b3
                             ).astype(o2_ref.dtype)


def _single_kernel(x_ref, w1_ref, b1_ref, w2_ref, b2_ref, w3_ref, b3_ref,
                   o_ref):
    o_ref[...] = _mlp_chain(x_ref[...], w1_ref[...], b1_ref[...],
                            w2_ref[...], b2_ref[...],
                            w3_ref[...], b3_ref[...]).astype(o_ref.dtype)


def _weight_specs(params):
    # Constant index_maps -> weights/biases stay VMEM-resident across the grid.
    return [
        pl.BlockSpec(params["w1"].shape, lambda i: (0, 0)),
        pl.BlockSpec(params["b1"].shape, lambda i: (0, 0)),
        pl.BlockSpec(params["w2"].shape, lambda i: (0, 0)),
        pl.BlockSpec(params["b2"].shape, lambda i: (0, 0)),
        pl.BlockSpec(params["w3"].shape, lambda i: (0, 0)),
        pl.BlockSpec(params["b3"].shape, lambda i: (0, 0)),
    ]


def _weight_args(params):
    return (params["w1"], params["b1"], params["w2"], params["b2"],
            params["w3"], params["b3"])


# ----------------------------------------------------------------------------
# SiameseNet.forward: (embedding_net(x1), embedding_net(x2)), shared weights,
# ONE fused pallas_call with two input streams and two output streams.
# ----------------------------------------------------------------------------
@jax.jit
def siamese_forward(params, x1, x2):
    B = x1.shape[0]
    xf1 = x1.reshape(B, -1)                 # contiguous reshape: no HBM copy
    xf2 = x2.reshape(B, -1)
    D = xf1.shape[1]
    E = params["w3"].shape[1]

    bb = _pick_block_b(B)
    xf1 = _pad_batch(xf1, bb)
    xf2 = _pad_batch(xf2, bb)
    n = xf1.shape[0]
    grid = (n // bb,)

    act_spec = pl.BlockSpec((bb, D), lambda i: (i, 0))
    out_spec = pl.BlockSpec((bb, E), lambda i: (i, 0))   # lane-dense (E=128)

    o1, o2 = pl.pallas_call(
        _siamese_kernel,
        out_shape=(jax.ShapeDtypeStruct((n, E), jnp.float32),
                   jax.ShapeDtypeStruct((n, E), jnp.float32)),
        grid_spec=pltpu.PrefetchScalarGridSpec(
            num_scalar_prefetch=0,
            grid=grid,
            in_specs=[act_spec, act_spec] + _weight_specs(params),
            out_specs=[out_spec, out_spec],
        ),
        compiler_params=pltpu.CompilerParams(
            dimension_semantics=("parallel",)),   # batch tiles are independent
    )(xf1, xf2, *_weight_args(params))
    return o1[:B], o2[:B]


# ----------------------------------------------------------------------------
# SiameseNet.get_embedding: single branch, same fused chain.
# ----------------------------------------------------------------------------
@jax.jit
def get_embedding(params, x):
    B = x.shape[0]
    xf = x.reshape(B, -1)
    D = xf.shape[1]
    E = params["w3"].shape[1]

    bb = _pick_block_b(B)
    xf = _pad_batch(xf, bb)
    n = xf.shape[0]

    out = pl.pallas_call(
        _single_kernel,
        out_shape=jax.ShapeDtypeStruct((n, E), jnp.float32),
        grid_spec=pltpu.PrefetchScalarGridSpec(
            num_scalar_prefetch=0,
            grid=(n // bb,),
            in_specs=[pl.BlockSpec((bb, D), lambda i: (i, 0))]
                     + _weight_specs(params),
            out_specs=pl.BlockSpec((bb, E), lambda i: (i, 0)),
        ),
        compiler_params=pltpu.CompilerParams(
            dimension_semantics=("parallel",)),
    )(xf, *_weight_args(params))
    return out[:B]


# ----------------------------------------------------------------------------
# Deterministic PyTorch-style init (uniform(-1/sqrt(fan_in), 1/sqrt(fan_in))).
# Weights stored pre-transposed as (fan_in, fan_out) in bf16; biases in f32.
# ----------------------------------------------------------------------------
def init_params(key, d_in=1024, h1=256, h2=256, e=128):
    def linear(k, fan_in, fan_out):
        kw, kb = jax.random.split(k)
        bound = 1.0 / float(np.sqrt(fan_in))
        w = jax.random.uniform(kw, (fan_in, fan_out), jnp.float32,
                               -bound, bound).astype(jnp.bfloat16)
        b = jax.random.uniform(kb, (1, fan_out), jnp.float32, -bound, bound)
        return w, b

    k1, k2, k3 = jax.random.split(key, 3)
    w1, b1 = linear(k1, d_in, h1)
    w2, b2 = linear(k2, h1, h2)
    w3, b3 = linear(k3, h2, e)
    return {"w1": w1, "b1": b1, "w2": w2, "b2": b2, "w3": w3, "b3": b3}


if __name__ == "__main__":
    B, C, HW = 2, 4, 16
    D_IN = C * HW * HW          # 1024
    EMB = 128

    key = jax.random.PRNGKey(0)
    kp, kx1, kx2 = jax.random.split(key, 3)
    params = init_params(kp, d_in=D_IN, h1=256, h2=256, e=EMB)
    x1 = jax.random.normal(kx1, (B, C, HW, HW), jnp.float32)
    x2 = jax.random.normal(kx2, (B, C, HW, HW), jnp.float32)

    out1, out2 = siamese_forward(params, x1, x2)
    emb1 = get_embedding(params, x1)
    jax.block_until_ready((out1, out2, emb1))
    assert out1.shape == (B, EMB) and out2.shape == (B, EMB)
    assert emb1.shape == (B, EMB)

    # Pure-JAX reference with identical bf16 casts / f32 accumulation.
    def ref_embed(x):
        h = x.reshape(x.shape[0], -1).astype(jnp.bfloat16)
        h = jnp.dot(h, params["w1"],
                    preferred_element_type=jnp.float32) + params["b1"]
        h = jnp.maximum(h, 0.0).astype(jnp.bfloat16)
        h = jnp.dot(h, params["w2"],
                    preferred_element_type=jnp.float32) + params["b2"]
        h = jnp.maximum(h, 0.0).astype(jnp.bfloat16)
        return jnp.dot(h, params["w3"],
                       preferred_element_type=jnp.float32) + params["b3"]

    np.testing.assert_allclose(np.asarray(out1), np.asarray(ref_embed(x1)),
                               rtol=2e-2, atol=2e-2)
    np.testing.assert_allclose(np.asarray(out2), np.asarray(ref_embed(x2)),
                               rtol=2e-2, atol=2e-2)
    np.testing.assert_allclose(np.asarray(emb1), np.asarray(ref_embed(x1)),
                               rtol=2e-2, atol=2e-2)
    print("KERNEL_OK")
</pallas_src>

<mosaic_0001>
module attributes {stable_mosaic.version = 11 : i64} {
  func.func @_siamese_kernel(%arg0: i32, %arg1: memref<8x1024xf32, #tpu.memory_space<vmem>>, %arg2: memref<8x1024xf32, #tpu.memory_space<vmem>>, %arg3: memref<1024x256xbf16, #tpu.memory_space<vmem>>, %arg4: memref<1x256xf32, #tpu.memory_space<vmem>>, %arg5: memref<256x256xbf16, #tpu.memory_space<vmem>>, %arg6: memref<1x256xf32, #tpu.memory_space<vmem>>, %arg7: memref<256x128xbf16, #tpu.memory_space<vmem>>, %arg8: memref<1x128xf32, #tpu.memory_space<vmem>>, %arg9: memref<8x128xf32, #tpu.memory_space<vmem>>, %arg10: memref<8x128xf32, #tpu.memory_space<vmem>>) attributes {dimension_semantics = [#tpu.dimension_semantics<parallel>], iteration_bounds = array<i64: 1>, scalar_prefetch = 0 : i64, scratch_operands = 0 : i64, tpu.core_type = #tpu.core_type<tc>, window_params = [{transform_indices = @transform_0, window_bounds = array<i64: 8, 1024>}, {transform_indices = @transform_1, window_bounds = array<i64: 8, 1024>}, {pipeline_mode = #tpu.pipeline_mode<synchronous>, transform_indices = @transform_2, window_bounds = array<i64: 1024, 256>}, {pipeline_mode = #tpu.pipeline_mode<synchronous>, transform_indices = @transform_3, window_bounds = array<i64: 1, 256>}, {pipeline_mode = #tpu.pipeline_mode<synchronous>, transform_indices = @transform_4, window_bounds = array<i64: 256, 256>}, {pipeline_mode = #tpu.pipeline_mode<synchronous>, transform_indices = @transform_5, window_bounds = array<i64: 1, 256>}, {pipeline_mode = #tpu.pipeline_mode<synchronous>, transform_indices = @transform_6, window_bounds = array<i64: 256, 128>}, {pipeline_mode = #tpu.pipeline_mode<synchronous>, transform_indices = @transform_7, window_bounds = array<i64: 1, 128>}, {transform_indices = @transform_8, window_bounds = array<i64: 8, 128>}, {transform_indices = @transform_9, window_bounds = array<i64: 8, 128>}]} {
    %c0 = arith.constant 0 : index
    %c0_0 = arith.constant 0 : index
    %0 = vector.load %arg3[%c0, %c0_0] : memref<1024x256xbf16, #tpu.memory_space<vmem>>, vector<1024x256xbf16>
    %c0_1 = arith.constant 0 : index
    %c0_2 = arith.constant 0 : index
    %1 = vector.load %arg4[%c0_1, %c0_2] : memref<1x256xf32, #tpu.memory_space<vmem>>, vector<1x256xf32>
    %c0_3 = arith.constant 0 : index
    %c0_4 = arith.constant 0 : index
    %2 = vector.load %arg5[%c0_3, %c0_4] : memref<256x256xbf16, #tpu.memory_space<vmem>>, vector<256x256xbf16>
    %c0_5 = arith.constant 0 : index
    %c0_6 = arith.constant 0 : index
    %3 = vector.load %arg6[%c0_5, %c0_6] : memref<1x256xf32, #tpu.memory_space<vmem>>, vector<1x256xf32>
    %c0_7 = arith.constant 0 : index
    %c0_8 = arith.constant 0 : index
    %4 = vector.load %arg7[%c0_7, %c0_8] : memref<256x128xbf16, #tpu.memory_space<vmem>>, vector<256x128xbf16>
    %c0_9 = arith.constant 0 : index
    %c0_10 = arith.constant 0 : index
    %5 = vector.load %arg8[%c0_9, %c0_10] : memref<1x128xf32, #tpu.memory_space<vmem>>, vector<1x128xf32>
    %c0_11 = arith.constant 0 : index
    %c0_12 = arith.constant 0 : index
    %6 = vector.load %arg1[%c0_11, %c0_12] : memref<8x1024xf32, #tpu.memory_space<vmem>>, vector<8x1024xf32>
    %7 = arith.truncf %6 : vector<8x1024xf32> to vector<8x1024xbf16>
    %cst = arith.constant dense<0.000000e+00> : vector<8x256xf32>
    %8 = tpu.matmul %7, %0, %cst {dimension_numbers = #tpu.dot_dimension_numbers<[1], [0], [0], [1], [0, 0, 1, 1], [], []>} : vector<8x1024xbf16>, vector<1024x256xbf16>, vector<8x256xf32> -> vector<8x256xf32>
    %9 = vector.broadcast %1 : vector<1x256xf32> to vector<8x256xf32>
    %10 = arith.addf %8, %9 : vector<8x256xf32>
    %cst_13 = arith.constant 0.000000e+00 : f32
    %11 = vector.broadcast %cst_13 : f32 to vector<8x256xf32>
    %12 = arith.maximumf %10, %11 : vector<8x256xf32>
    %13 = arith.truncf %12 : vector<8x256xf32> to vector<8x256xbf16>
    %cst_14 = arith.constant dense<0.000000e+00> : vector<8x256xf32>
    %14 = tpu.matmul %13, %2, %cst_14 {dimension_numbers = #tpu.dot_dimension_numbers<[1], [0], [0], [1], [0, 0, 1, 1], [], []>} : vector<8x256xbf16>, vector<256x256xbf16>, vector<8x256xf32> -> vector<8x256xf32>
    %15 = vector.broadcast %3 : vector<1x256xf32> to vector<8x256xf32>
    %16 = arith.addf %14, %15 : vector<8x256xf32>
    %cst_15 = arith.constant 0.000000e+00 : f32
    %17 = vector.broadcast %cst_15 : f32 to vector<8x256xf32>
    %18 = arith.maximumf %16, %17 : vector<8x256xf32>
    %19 = arith.truncf %18 : vector<8x256xf32> to vector<8x256xbf16>
    %cst_16 = arith.constant dense<0.000000e+00> : vector<8x128xf32>
    %20 = tpu.matmul %19, %4, %cst_16 {dimension_numbers = #tpu.dot_dimension_numbers<[1], [0], [0], [1], [0, 0, 1, 1], [], []>} : vector<8x256xbf16>, vector<256x128xbf16>, vector<8x128xf32> -> vector<8x128xf32>
    %21 = vector.broadcast %5 : vector<1x128xf32> to vector<8x128xf32>
    %22 = arith.addf %20, %21 : vector<8x128xf32>
    %c0_17 = arith.constant 0 : index
    %c0_18 = arith.constant 0 : index
    %23 = vector.load %arg9[%c0_17, %c0_18] : memref<8x128xf32, #tpu.memory_space<vmem>>, vector<8x128xf32>
    tpu.vector_store %arg9[%c0_17, %c0_18], %22 {strides = array<i32>} : memref<8x128xf32, #tpu.memory_space<vmem>>, vector<8x128xf32>,
    %c0_19 = arith.constant 0 : index
    %c0_20 = arith.constant 0 : index
    %24 = vector.load %arg2[%c0_19, %c0_20] : memref<8x1024xf32, #tpu.memory_space<vmem>>, vector<8x1024xf32>
    %25 = arith.truncf %24 : vector<8x1024xf32> to vector<8x1024xbf16>
    %cst_21 = arith.constant dense<0.000000e+00> : vector<8x256xf32>
    %26 = tpu.matmul %25, %0, %cst_21 {dimension_numbers = #tpu.dot_dimension_numbers<[1], [0], [0], [1], [0, 0, 1, 1], [], []>} : vector<8x1024xbf16>, vector<1024x256xbf16>, vector<8x256xf32> -> vector<8x256xf32>
    %27 = vector.broadcast %1 : vector<1x256xf32> to vector<8x256xf32>
    %28 = arith.addf %26, %27 : vector<8x256xf32>
    %cst_22 = arith.constant 0.000000e+00 : f32
    %29 = vector.broadcast %cst_22 : f32 to vector<8x256xf32>
    %30 = arith.maximumf %28, %29 : vector<8x256xf32>
    %31 = arith.truncf %30 : vector<8x256xf32> to vector<8x256xbf16>
    %cst_23 = arith.constant dense<0.000000e+00> : vector<8x256xf32>
    %32 = tpu.matmul %31, %2, %cst_23 {dimension_numbers = #tpu.dot_dimension_numbers<[1], [0], [0], [1], [0, 0, 1, 1], [], []>} : vector<8x256xbf16>, vector<256x256xbf16>, vector<8x256xf32> -> vector<8x256xf32>
    %33 = vector.broadcast %3 : vector<1x256xf32> to vector<8x256xf32>
    %34 = arith.addf %32, %33 : vector<8x256xf32>
    %cst_24 = arith.constant 0.000000e+00 : f32
    %35 = vector.broadcast %cst_24 : f32 to vector<8x256xf32>
    %36 = arith.maximumf %34, %35 : vector<8x256xf32>
    %37 = arith.truncf %36 : vector<8x256xf32> to vector<8x256xbf16>
    %cst_25 = arith.constant dense<0.000000e+00> : vector<8x128xf32>
    %38 = tpu.matmul %37, %4, %cst_25 {dimension_numbers = #tpu.dot_dimension_numbers<[1], [0], [0], [1], [0, 0, 1, 1], [], []>} : vector<8x256xbf16>, vector<256x128xbf16>, vector<8x128xf32> -> vector<8x128xf32>
    %39 = vector.broadcast %5 : vector<1x128xf32> to vector<8x128xf32>
    %40 = arith.addf %38, %39 : vector<8x128xf32>
    %c0_26 = arith.constant 0 : index
    %c0_27 = arith.constant 0 : index
    %41 = vector.load %arg10[%c0_26, %c0_27] : memref<8x128xf32, #tpu.memory_space<vmem>>, vector<8x128xf32>
    tpu.vector_store %arg10[%c0_26, %c0_27], %40 {strides = array<i32>} : memref<8x128xf32, #tpu.memory_space<vmem>>, vector<8x128xf32>,
    return
  }
  func.func @transform_0(%arg0: i32) -> (i32, i32) {
    %c0_i32 = arith.constant 0 : i32
    %c0_i32_0 = arith.constant 0 : i32
    return %arg0, %c0_i32 : i32, i32
  }
  func.func @transform_1(%arg0: i32) -> (i32, i32) {
    %c0_i32 = arith.constant 0 : i32
    %c0_i32_0 = arith.constant 0 : i32
    return %arg0, %c0_i32 : i32, i32
  }
  func.func @transform_2(%arg0: i32) -> (i32, i32) {
    %c0_i32 = arith.constant 0 : i32
    %c0_i32_0 = arith.constant 0 : i32
    %c0_i32_1 = arith.constant 0 : i32
    return %c0_i32, %c0_i32_0 : i32, i32
  }
  func.func @transform_3(%arg0: i32) -> (i32, i32) {
    %c0_i32 = arith.constant 0 : i32
    %c0_i32_0 = arith.constant 0 : i32
    %c0_i32_1 = arith.constant 0 : i32
    return %c0_i32, %c0_i32_0 : i32, i32
  }
  func.func @transform_4(%arg0: i32) -> (i32, i32) {
    %c0_i32 = arith.constant 0 : i32
    %c0_i32_0 = arith.constant 0 : i32
    %c0_i32_1 = arith.constant 0 : i32
    return %c0_i32, %c0_i32_0 : i32, i32
  }
  func.func @transform_5(%arg0: i32) -> (i32, i32) {
    %c0_i32 = arith.constant 0 : i32
    %c0_i32_0 = arith.constant 0 : i32
    %c0_i32_1 = arith.constant 0 : i32
    return %c0_i32, %c0_i32_0 : i32, i32
  }
  func.func @transform_6(%arg0: i32) -> (i32, i32) {
    %c0_i32 = arith.constant 0 : i32
    %c0_i32_0 = arith.constant 0 : i32
    %c0_i32_1 = arith.constant 0 : i32
    return %c0_i32, %c0_i32_0 : i32, i32
  }
  func.func @transform_7(%arg0: i32) -> (i32, i32) {
    %c0_i32 = arith.constant 0 : i32
    %c0_i32_0 = arith.constant 0 : i32
    %c0_i32_1 = arith.constant 0 : i32
    return %c0_i32, %c0_i32_0 : i32, i32
  }
  func.func @transform_8(%arg0: i32) -> (i32, i32) {
    %c0_i32 = arith.constant 0 : i32
    %c0_i32_0 = arith.constant 0 : i32
    return %arg0, %c0_i32 : i32, i32
  }
  func.func @transform_9(%arg0: i32) -> (i32, i32) {
    %c0_i32 = arith.constant 0 : i32
    %c0_i32_0 = arith.constant 0 : i32
    return %arg0, %c0_i32 : i32, i32
  }
}

</mosaic_0001>

<bundles_post_ra>
// kernel: siamese_forward.1
= control target key start
LH: loop header
LB: loop body
LE: loop exit
PB: predicated region body
PF: predicated region fallthrough
CT: control target
= control target key end

     0   :  { %15 = vsyncpa [#allocation3], 0  ;;  %s3129_s0 = inlined_call_operand.vmem [shape: f32[8,1024], index: 0, kind: input, shape index: {}]   ;;  %s3130_s1 = inlined_call_operand.vmem [shape: f32[8,1024], index: 1, kind: input, shape index: {}]   ;;  %s3131_s2 = inlined_call_operand.hbm [shape: bf16[1024,256], index: 2, kind: input, shape index: {}]   ;;  %s3132_s3 = inlined_call_operand.vmem [shape: f32[1,256], index: 3, kind: input, shape index: {}]   ;;  %s3133_s4 = inlined_call_operand.vmem [shape: bf16[256,256], index: 4, kind: input, shape index: {}]   ;;  %s3134_s5 = inlined_call_operand.vmem [shape: f32[1,256], index: 5, kind: input, shape index: {}]   ;;  %s3135_s6 = inlined_call_operand.hbm [shape: bf16[256,128], index: 6, kind: input, shape index: {}]   ;;  %s3136_s7 = inlined_call_operand.vmem [shape: f32[1,128], index: 7, kind: input, shape index: {}]   ;;  %s3137_s8 = inlined_call_operand.vmem [shape: f32[8,128], index: 8, kind: output, shape index: {0}]   ;;  %s3138_s9 = inlined_call_operand.vmem [shape: f32[8,128], index: 9, kind: output, shape index: {1}]  }
   0x1   :  { %16 = vsyncpa [#allocation5], 0  ;;  %s2322_s30 = smov [#allocation2]   ;;  %s2274_s13 = scalar_lea.hbm %s3131_s2, 16384 }
   0x2   :  { %s26_s10 = sshll.u32 %s2322_s30, 4  ;;  %p2275_p0 = scmp.ne.s32.totalorder %s3131_s2, %s2274_s13  ;;  %s27_s10 = int_to_ptr.vmem [resolvable:$true] %s26_s10 }
   0x3   :  { %p2278_p1 = scmp.lt.u32.totalorder %s2274_s13, %s3131_s2 }
   0x5   :  { %p2280_p2 = pnand %p2278_p1, %p2275_p0 }
   0x7   :  { %2283 = shalt.err (!%p2280_p2)
}
   0x8   :  { %s2284_s18 = scalar_lea.vmem %s27_s10, 16384  ;;  %p2289_p4 = scmp.lt.s32.totalorder %s27_s10, %s27_s10 }
   0x9   :  { %p2285_p3 = scmp.ne.s32.totalorder %s27_s10, %s2284_s18  ;;  %p2290_p5 = scmp.lt.s32.totalorder %s2284_s18, %s2284_s18 }
   0xb   :  { %p2291_p6 = por %p2290_p5, %p2289_p4 }
   0xd   :  { %p2292_p7 = pnand %p2291_p6, %p2285_p3 }
   0xf   :  { %2295 = shalt.err (!%p2292_p7)
}
  0x10   :  { %s2323_s19 = smov 128   ;;  %s2324_s20 = smov 8  }
  0x11   :  { %32 = dma.hbm_to_vmem [thread:$0]  %s3131_s2, 16384, %s27_s10, [#allocation3], %s2323_s19, %s2323_s19, %s2324_s20  }
  0x12   :  { %s2325_s23 = smov [#allocation4]   ;;  %s2296_s27 = scalar_lea.hbm %s3135_s6, 2048 }
  0x13   :  { %s44_s24 = sshll.u32 %s2325_s23, 4  ;;  %p2297_p8 = scmp.ne.s32.totalorder %s3135_s6, %s2296_s27  ;;  %s45_s24 = int_to_ptr.vmem [resolvable:$true] %s44_s24 }
  0x14   :  { %p2300_p9 = scmp.lt.u32.totalorder %s2296_s27, %s3135_s6 }
  0x16   :  { %p2302_p10 = pnand %p2300_p9, %p2297_p8 }
  0x18   :  { %2305 = shalt.err (!%p2302_p10)
}
  0x19   :  { %s2306_s12 = scalar_lea.vmem %s45_s24, 2048  ;;  %p2311_p12 = scmp.lt.s32.totalorder %s45_s24, %s45_s24 }
  0x1a   :  { %p2307_p11 = scmp.ne.s32.totalorder %s45_s24, %s2306_s12  ;;  %p2312_p13 = scmp.lt.s32.totalorder %s2306_s12, %s2306_s12 }
  0x1c   :  { %p2313_p0 = por %p2312_p13, %p2311_p12 }
  0x1e   :  { %p2314_p1 = pnand %p2313_p0, %p2307_p11 }
  0x20   :  { %2317 = shalt.err (!%p2314_p1)
}
  0x21   :  { %s2326_s2 = smov 64   ;;  %s2327_s10 = smov 4  }
  0x22   :  { %50 = dma.hbm_to_vmem [thread:$0]  %s3135_s6, 2048, %s45_s24, [#allocation5], %s2326_s2, %s2326_s2, %s2327_s10  }
  0x23   :  { %2318 = dma.done.wait [#allocation3], 16384  }
  0x24   :  { %2319 = vsyncadd [#allocation3], 4294950912 }
  0x25   :  { %2320 = dma.done.wait [#allocation5], 2048  }
  0x26   :  { %2321 = vsyncadd [#allocation5], 4294965248  ;;  %v1984_v0 = vld [vmem:[#allocation2 + $0x4] ss:$8 sps:$4 sm:$0xff]   ;;  %v1986_v1 = vld [vmem:[#allocation2] ss:$8 sps:$4 sm:$0xff]  }
  0x27   :  { %922 = vmatprep.subr.bf16.mxu0 %v1984_v0  ;;  %v1987_v2 = vld [vmem:[#allocation2 + $0x14] ss:$8 sps:$4 sm:$0xff]   ;;  %v1989_v3 = vld [vmem:[#allocation2 + $0x10] ss:$8 sps:$4 sm:$0xff]   ;;  %v1990_v4 = vld [vmem:[#allocation2 + $0x24] ss:$8 sps:$4 sm:$0xff]  }
  0x28   :  { %923 = vmatpush1.bf16.msra.mxu0 %v1986_v1  ;;  %v1992_v5 = vld [vmem:[#allocation2 + $0x20] ss:$8 sps:$4 sm:$0xff]   ;;  %v1993_v6 = vld [vmem:[#allocation2 + $0x34] ss:$8 sps:$4 sm:$0xff]   ;;  %v1995_v7 = vld [vmem:[#allocation2 + $0x30] ss:$8 sps:$4 sm:$0xff]  }
  0x29   :  { %924 = vmatprep.subr.bf16.mxu0 %v1987_v2  ;;  %v1996_v8 = vld [vmem:[#allocation2 + $0x44] ss:$8 sps:$4 sm:$0xff]   ;;  %v1998_v9 = vld [vmem:[#allocation2 + $0x40] ss:$8 sps:$4 sm:$0xff]   ;;  %v1999_v10 = vld [vmem:[#allocation2 + $0x54] ss:$8 sps:$4 sm:$0xff]  }
  0x2a   :  { %v2001_v11 = vld [vmem:[#allocation2 + $0x50] ss:$8 sps:$4 sm:$0xff]   ;;  %v2002_v12 = vld [vmem:[#allocation2 + $0x64] ss:$8 sps:$4 sm:$0xff]   ;;  %v2004_v15 = vld [vmem:[#allocation2 + $0x60] ss:$8 sps:$4 sm:$0xff]  }
  0x2b   :  { %v256_v13 = vld [vmem:[%s3129_s0 + $0x8] sm:$0xff]  ;;  %v2005_v16 = vld [vmem:[#allocation2 + $0x74] ss:$8 sps:$4 sm:$0xff]   ;;  %v2007_v17 = vld [vmem:[#allocation2 + $0x70] ss:$8 sps:$4 sm:$0xff]  }
  0x2c   :  { %925 = vmatpush1.bf16.msra.mxu0 %v1989_v3  ;;  %v264_v14 = vpack.c.bf16 %v256_v13, %v256_v13  ;;  %v2008_v18 = vld [vmem:[#allocation2 + $0x84] ss:$8 sps:$4 sm:$0xff]   ;;  %v2010_v19 = vld [vmem:[#allocation2 + $0x80] ss:$8 sps:$4 sm:$0xff]   ;;  %v2011_v20 = vld [vmem:[#allocation2 + $0x94] ss:$8 sps:$4 sm:$0xff]  }
  0x2d   :  { %926 = vmatprep.subr.bf16.mxu0 %v1990_v4  ;;  %v2013_v21 = vld [vmem:[#allocation2 + $0x90] ss:$8 sps:$4 sm:$0xff]   ;;  %v2014_v22 = vld [vmem:[#allocation2 + $0xa4] ss:$8 sps:$4 sm:$0xff]   ;;  %v2016_v23 = vld [vmem:[#allocation2 + $0xa0] ss:$8 sps:$4 sm:$0xff]  }
  0x2e   :  { %954 = vmatprep.mubr.bf16.mxu0 %v264_v14  ;;  %v2017_v24 = vld [vmem:[#allocation2 + $0xb4] ss:$8 sps:$4 sm:$0xff]   ;;  %v2019_v25 = vld [vmem:[#allocation2 + $0xb0] ss:$8 sps:$4 sm:$0xff]   ;;  %v2020_v26 = vld [vmem:[#allocation2 + $0xc4] ss:$8 sps:$4 sm:$0xff]  }
  0x2f   :  { %v2022_v27 = vld [vmem:[#allocation2 + $0xc0] ss:$8 sps:$4 sm:$0xff]   ;;  %v2023_v28 = vld [vmem:[#allocation2 + $0xd4] ss:$8 sps:$4 sm:$0xff]   ;;  %v2025_v29 = vld [vmem:[#allocation2 + $0xd0] ss:$8 sps:$4 sm:$0xff]  }
  0x30   :  { %927 = vmatpush1.bf16.msra.mxu0 %v1992_v5  ;;  %v2026_v30 = vld [vmem:[#allocation2 + $0xe4] ss:$8 sps:$4 sm:$0xff]   ;;  %v2028_v31 = vld [vmem:[#allocation2 + $0xe0] ss:$8 sps:$4 sm:$0xff]   ;;  %v2029_v32 = vld [vmem:[#allocation2 + $0xf4] ss:$8 sps:$4 sm:$0xff]  }
  0x31   :  { %928 = vmatprep.subr.bf16.mxu0 %v1993_v6  ;;  %v2031_v33 = vld [vmem:[#allocation2 + $0xf0] ss:$8 sps:$4 sm:$0xff]   ;;  %v2034_v34 = vld [vmem:[#allocation2 + $0x104] ss:$8 sps:$4 sm:$0xff]   ;;  %v2032_v38 = vld [vmem:[#allocation2 + $0x100] ss:$8 sps:$4 sm:$0xff]  }
  0x32   :  { %v255_v35 = vld [vmem:[%s3129_s0] sm:$0xff]  ;;  %v258_v36 = vld [vmem:[%s3129_s0 + $0x18] sm:$0xff]  ;;  %v257_v6 = vld [vmem:[%s3129_s0 + $0x10] sm:$0xff] }
  0x33   :  { %v263_v37 = vpack.c.bf16 %v255_v35, %v255_v35  ;;  %v266_v39 = vpack.c.bf16 %v258_v36, %v258_v36  ;;  %v2411_v40 = vld [vmem:[#allocation2 + $0x114] ss:$8 sps:$4 sm:$0xff]   ;;  %v2413_v41 = vld [vmem:[#allocation2 + $0x110] ss:$8 sps:$4 sm:$0xff]   ;;  %v2416_v42 = vld [vmem:[#allocation2 + $0x124] ss:$8 sps:$4 sm:$0xff]  }
  0x34   :  { %929 = vmatpush1.bf16.msra.mxu0 %v1995_v7  ;;  %v2419_v43 = vld [vmem:[#allocation2 + $0x120] ss:$8 sps:$4 sm:$0xff]   ;;  %v2421_v44 = vld [vmem:[#allocation2 + $0x134] ss:$8 sps:$4 sm:$0xff]   ;;  %v2425_v45 = vld [vmem:[#allocation2 + $0x130] ss:$8 sps:$4 sm:$0xff]  }
  0x35   :  { %930 = vmatprep.subr.bf16.mxu0 %v1996_v8  ;;  %v2427_v46 = vld [vmem:[#allocation2 + $0x144] ss:$8 sps:$4 sm:$0xff]   ;;  %v2431_v47 = vld [vmem:[#allocation2 + $0x140] ss:$8 sps:$4 sm:$0xff]   ;;  %v2433_v48 = vld [vmem:[#allocation2 + $0x154] ss:$8 sps:$4 sm:$0xff]  }
  0x36   :  { %v2437_v49 = vld [vmem:[#allocation2 + $0x150] ss:$8 sps:$4 sm:$0xff]   ;;  %v2439_v50 = vld [vmem:[#allocation2 + $0x164] ss:$8 sps:$4 sm:$0xff]   ;;  %v2443_v51 = vld [vmem:[#allocation2 + $0x160] ss:$8 sps:$4 sm:$0xff]  }
  0x37   :  { %v2445_v52 = vld [vmem:[#allocation2 + $0x174] ss:$8 sps:$4 sm:$0xff]   ;;  %v2449_v53 = vld [vmem:[#allocation2 + $0x170] ss:$8 sps:$4 sm:$0xff]   ;;  %v2451_v54 = vld [vmem:[#allocation2 + $0x184] ss:$8 sps:$4 sm:$0xff]  }
  0x38   :  { %931 = vmatpush1.bf16.msra.mxu0 %v1998_v9  ;;  %v2455_v55 = vld [vmem:[#allocation2 + $0x180] ss:$8 sps:$4 sm:$0xff]   ;;  %v2457_v56 = vld [vmem:[#allocation2 + $0x194] ss:$8 sps:$4 sm:$0xff]   ;;  %v2461_v57 = vld [vmem:[#allocation2 + $0x190] ss:$8 sps:$4 sm:$0xff]   ;;  %v265_v9 = vpack.c.bf16 %v257_v6, %v257_v6 }
  0x39   :  { %932 = vmatprep.subr.bf16.mxu0 %v1999_v10  ;;  %v2463_v58 = vld [vmem:[#allocation2 + $0x1a4] ss:$8 sps:$4 sm:$0xff]   ;;  %v2467_v59 = vld [vmem:[#allocation2 + $0x1a0] ss:$8 sps:$4 sm:$0xff]   ;;  %v2469_v60 = vld [vmem:[#allocation2 + $0x1b4] ss:$8 sps:$4 sm:$0xff]  }
  0x3a   :  { %v2473_v61 = vld [vmem:[#allocation2 + $0x1b0] ss:$8 sps:$4 sm:$0xff]   ;;  %v2476_v62 = vld [vmem:[#allocation2 + $0x1c4] ss:$8 sps:$4 sm:$0xff]   ;;  %v2479_v63 = vld [vmem:[#allocation2 + $0x1c0] ss:$8 sps:$4 sm:$0xff]  }
  0x3b   :  { %v2482_v0 = vld [vmem:[#allocation2 + $0x1d4] ss:$8 sps:$4 sm:$0xff]   ;;  %v2485_v1 = vld [vmem:[#allocation2 + $0x1d0] ss:$8 sps:$4 sm:$0xff]   ;;  %v2488_v2 = vld [vmem:[#allocation2 + $0x1e4] ss:$8 sps:$4 sm:$0xff]  }
  0x3c   :  { %933 = vmatpush1.bf16.msra.mxu0 %v2001_v11  ;;  %3202 = vst [vmem:[#allocation8_spill] sm:$0xff] %v2488_v2  ;;  %v2491_v3 = vld [vmem:[#allocation2 + $0x1e0] ss:$8 sps:$4 sm:$0xff]   ;;  %v2494_v4 = vld [vmem:[#allocation2 + $0x1f4] ss:$8 sps:$4 sm:$0xff]  }
  0x3d   :  { %934 = vmatprep.subr.bf16.mxu0 %v2002_v12  ;;  %3203 = vst [vmem:[#allocation9_spill] sm:$0xff] %v2491_v3  ;;  %3204 = vst [vmem:[#allocation10_spill] sm:$0xff] %v2494_v4  ;;  %v2497_v5 = vld [vmem:[#allocation2 + $0x1f0] ss:$8 sps:$4 sm:$0xff]   ;;  %v2503_v7 = vld [vmem:[#allocation2 + $0x204] ss:$8 sps:$4 sm:$0xff]  }
  0x3e   :  { %3205 = vst [vmem:[#allocation11_spill] sm:$0xff] %v2497_v5  ;;  %3206 = vst [vmem:[#allocation12_spill] sm:$0xff] %v2503_v7  ;;  %v260_v8 = vld [vmem:[%s3129_s0 + $0x28] sm:$0xff]  ;;  %v2512_v12 = vld [vmem:[#allocation2 + $0x214] ss:$8 sps:$4 sm:$0xff]  }
  0x3f   :  { %v2509_v10 = vld [vmem:[#allocation2 + $0x200] ss:$8 sps:$4 sm:$0xff]   ;;  %v268_v11 = vpack.c.bf16 %v260_v8, %v260_v8  ;;  %3208 = vst [vmem:[#allocation14_spill] sm:$0xff] %v2512_v12  ;;  %v2517_v13 = vld [vmem:[%s3133_s4 + $0x4] ss:$8 sps:$4 sm:$0xff]  }
  0x40   :  { %935 = vmatpush1.bf16.msra.mxu0 %v2004_v15  ;;  %3207 = vst [vmem:[#allocation13_spill] sm:$0xff] %v2509_v10  ;;  %v2522_v14 = vld [vmem:[%s3133_s4] ss:$8 sps:$4 sm:$0xff]   ;;  %v2527_v15 = vld [vmem:[%s3133_s4 + $0x14] ss:$8 sps:$4 sm:$0xff]   ;;  %1261 = vmatprep.subr.bf16.mxu1 %v2517_v13 }
  0x41   :  { %936 = vmatprep.subr.bf16.mxu0 %v2005_v16  ;;  %v2530_v16 = vld [vmem:[#allocation2 + $0x210] ss:$8 sps:$4 sm:$0xff]   ;;  %1262 = vmatpush1.bf16.msra.mxu1 %v2522_v14  ;;  %v2618_v35 = vld [vmem:[%s3133_s4 + $0x64] ss:$8 sps:$4 sm:$0xff]   ;;  %v2621_v36 = vld [vmem:[#allocation2 + $0x260] ss:$8 sps:$4 sm:$0xff]  }
  0x42   :  { %3209 = vst [vmem:[#allocation15_spill] sm:$0xff] %v2530_v16  ;;  %1263 = vmatprep.subr.bf16.mxu1 %v2527_v15  ;;  %3219 = vst [vmem:[#allocation25_spill] sm:$0xff] %v2621_v36  ;;  %v2639_v6 = vld [vmem:[#allocation2 + $0x270] ss:$8 sps:$4 sm:$0xff]   ;;  %v2642_v8 = vld [vmem:[#allocation2 + $0x284] ss:$8 sps:$4 sm:$0xff]  }
  0x43   :  { %3221 = vst [vmem:[#allocation27_spill] sm:$0xff] %v2639_v6  ;;  %3222 = vst [vmem:[#allocation28_spill] sm:$0xff] %v2642_v8 }
  0x44   :  { %937 = vmatpush1.bf16.msra.mxu0 %v2007_v17  ;;  %v2533_v17 = vld [vmem:[#allocation2 + $0x224] ss:$8 sps:$4 sm:$0xff]  }
  0x45   :  { %938 = vmatprep.subr.bf16.mxu0 %v2008_v18  ;;  %3210 = vst [vmem:[#allocation16_spill] sm:$0xff] %v2533_v17  ;;  %v2540_v18 = vld [vmem:[%s3133_s4 + $0x10] ss:$8 sps:$4 sm:$0xff]  }
  0x46   :  { %1264 = vmatpush1.bf16.msra.mxu1 %v2540_v18 }
  0x48   :  { %939 = vmatpush1.bf16.msra.mxu0 %v2010_v19  ;;  %v2546_v19 = vld [vmem:[%s3133_s4 + $0x24] ss:$8 sps:$4 sm:$0xff]  }
  0x49   :  { %940 = vmatprep.subr.bf16.mxu0 %v2011_v20  ;;  %v2549_v20 = vld [vmem:[#allocation2 + $0x220] ss:$8 sps:$4 sm:$0xff]   ;;  %1265 = vmatprep.subr.bf16.mxu1 %v2546_v19 }
  0x4a   :  { %3211 = vst [vmem:[#allocation17_spill] sm:$0xff] %v2549_v20 }
  0x4c   :  { %941 = vmatpush1.bf16.msra.mxu0 %v2013_v21  ;;  %v2552_v21 = vld [vmem:[#allocation2 + $0x234] ss:$8 sps:$4 sm:$0xff]  }
  0x4d   :  { %942 = vmatprep.subr.bf16.mxu0 %v2014_v22  ;;  %3212 = vst [vmem:[#allocation18_spill] sm:$0xff] %v2552_v21  ;;  %v2558_v22 = vld [vmem:[%s3133_s4 + $0x20] ss:$8 sps:$4 sm:$0xff]  }
  0x4e   :  { %1266 = vmatpush1.bf16.msra.mxu1 %v2558_v22 }
  0x50   :  { %943 = vmatpush1.bf16.msra.mxu0 %v2016_v23  ;;  %v2564_v23 = vld [vmem:[%s3133_s4 + $0x34] ss:$8 sps:$4 sm:$0xff]  }
  0x51   :  { %944 = vmatprep.subr.bf16.mxu0 %v2017_v24  ;;  %v2567_v24 = vld [vmem:[#allocation2 + $0x230] ss:$8 sps:$4 sm:$0xff]   ;;  %1267 = vmatprep.subr.bf16.mxu1 %v2564_v23 }
  0x52   :  { %3213 = vst [vmem:[#allocation19_spill] sm:$0xff] %v2567_v24 }
  0x54   :  { %945 = vmatpush1.bf16.msra.mxu0 %v2019_v25  ;;  %v2570_v25 = vld [vmem:[#allocation2 + $0x244] ss:$8 sps:$4 sm:$0xff]  }
  0x55   :  { %946 = vmatprep.subr.bf16.mxu0 %v2020_v26  ;;  %3214 = vst [vmem:[#allocation20_spill] sm:$0xff] %v2570_v25  ;;  %v2576_v26 = vld [vmem:[%s3133_s4 + $0x30] ss:$8 sps:$4 sm:$0xff]  }
  0x56   :  { %1268 = vmatpush1.bf16.msra.mxu1 %v2576_v26 }
  0x58   :  { %947 = vmatpush1.bf16.msra.mxu0 %v2022_v27  ;;  %v2582_v27 = vld [vmem:[%s3133_s4 + $0x44] ss:$8 sps:$4 sm:$0xff]  }
  0x59   :  { %948 = vmatprep.subr.bf16.mxu0 %v2023_v28  ;;  %v2585_v28 = vld [vmem:[#allocation2 + $0x240] ss:$8 sps:$4 sm:$0xff]   ;;  %1269 = vmatprep.subr.bf16.mxu1 %v2582_v27 }
  0x5a   :  { %3215 = vst [vmem:[#allocation21_spill] sm:$0xff] %v2585_v28 }
  0x5c   :  { %949 = vmatpush1.bf16.msra.mxu0 %v2025_v29  ;;  %v2588_v29 = vld [vmem:[#allocation2 + $0x254] ss:$8 sps:$4 sm:$0xff]  }
  0x5d   :  { %950 = vmatprep.subr.bf16.mxu0 %v2026_v30  ;;  %3216 = vst [vmem:[#allocation22_spill] sm:$0xff] %v2588_v29  ;;  %v2594_v30 = vld [vmem:[%s3133_s4 + $0x40] ss:$8 sps:$4 sm:$0xff]  }
  0x5e   :  { %1270 = vmatpush1.bf16.msra.mxu1 %v2594_v30 }
  0x60   :  { %951 = vmatpush1.bf16.msra.mxu0 %v2028_v31  ;;  %v2600_v31 = vld [vmem:[%s3133_s4 + $0x54] ss:$8 sps:$4 sm:$0xff]  }
  0x61   :  { %952 = vmatprep.subr.bf16.mxu0 %v2029_v32  ;;  %v2603_v32 = vld [vmem:[#allocation2 + $0x250] ss:$8 sps:$4 sm:$0xff]   ;;  %1271 = vmatprep.subr.bf16.mxu1 %v2600_v31 }
  0x62   :  { %3217 = vst [vmem:[#allocation23_spill] sm:$0xff] %v2603_v32 }
  0x64   :  { %953 = vmatpush1.bf16.msra.mxu0 %v2031_v33  ;;  %v2606_v33 = vld [vmem:[#allocation2 + $0x264] ss:$8 sps:$4 sm:$0xff]  }
  0x65   :  { %963 = vmatprep.subr.bf16.mxu0 %v2034_v34  ;;  %3218 = vst [vmem:[#allocation24_spill] sm:$0xff] %v2606_v33  ;;  %v2612_v34 = vld [vmem:[%s3133_s4 + $0x50] ss:$8 sps:$4 sm:$0xff]  }
  0x66   :  { %1272 = vmatpush1.bf16.msra.mxu1 %v2612_v34 }
  0x67   :  { %955 = vmatmul.mubr.bf16.vlgmr.msra.gmra.mrb[0].mxu0 %v263_v37  ;;  %v2624_v37 = vld [vmem:[#allocation2 + $0x274] ss:$8 sps:$4 sm:$0xff]   ;;  %1273 = vmatprep.subr.bf16.mxu1 %v2618_v35 }
  0x68   :  { %964 = vmatpush1.bf16.msra.mxu0 %v2032_v38  ;;  %995 = vmatprep.mubr.bf16.mxu0 %v266_v39  ;;  %3220 = vst [vmem:[#allocation26_spill] sm:$0xff] %v2624_v37  ;;  %v2630_v38 = vld [vmem:[%s3133_s4 + $0x60] ss:$8 sps:$4 sm:$0xff]   ;;  %v2636_v39 = vld [vmem:[%s3133_s4 + $0x74] ss:$8 sps:$4 sm:$0xff]  }
  0x69   :  { %965 = vmatprep.subr.bf16.mxu0 %v2411_v40 }
  0x6a   :  { %1274 = vmatpush1.bf16.msra.mxu1 %v2630_v38 }
  0x6b   :  { %1275 = vmatprep.subr.bf16.mxu1 %v2636_v39 }
  0x6c   :  { %966 = vmatpush1.bf16.msra.mxu0 %v2413_v41 }
  0x6d   :  { %967 = vmatprep.subr.bf16.mxu0 %v2416_v42 }
  0x70   :  { %968 = vmatpush1.bf16.msra.mxu0 %v2419_v43 }
  0x71   :  { %969 = vmatprep.subr.bf16.mxu0 %v2421_v44 }
  0x74   :  { %970 = vmatpush1.bf16.msra.mxu0 %v2425_v45 }
  0x75   :  { %971 = vmatprep.subr.bf16.mxu0 %v2427_v46 }
  0x78   :  { %972 = vmatpush1.bf16.msra.mxu0 %v2431_v47 }
  0x79   :  { %973 = vmatprep.subr.bf16.mxu0 %v2433_v48 }
  0x7c   :  { %974 = vmatpush1.bf16.msra.mxu0 %v2437_v49 }
  0x7d   :  { %975 = vmatprep.subr.bf16.mxu0 %v2439_v50 }
  0x80   :  { %976 = vmatpush1.bf16.msra.mxu0 %v2443_v51 }
  0x81   :  { %977 = vmatprep.subr.bf16.mxu0 %v2445_v52 }
  0x84   :  { %978 = vmatpush1.bf16.msra.mxu0 %v2449_v53 }
  0x85   :  { %979 = vmatprep.subr.bf16.mxu0 %v2451_v54 }
  0x88   :  { %980 = vmatpush1.bf16.msra.mxu0 %v2455_v55 }
  0x89   :  { %981 = vmatprep.subr.bf16.mxu0 %v2457_v56 }
  0x8c   :  { %982 = vmatpush1.bf16.msra.mxu0 %v2461_v57 }
  0x8d   :  { %983 = vmatprep.subr.bf16.mxu0 %v2463_v58 }
  0x90   :  { %984 = vmatpush1.bf16.msra.mxu0 %v2467_v59 }
  0x91   :  { %985 = vmatprep.subr.bf16.mxu0 %v2469_v60 }
  0x94   :  { %986 = vmatpush1.bf16.msra.mxu0 %v2473_v61 }
  0x95   :  { %987 = vmatprep.subr.bf16.mxu0 %v2476_v62 }
  0x98   :  { %988 = vmatpush1.bf16.msra.mxu0 %v2479_v63 }
  0x99   :  { %989 = vmatprep.subr.bf16.mxu0 %v2482_v0 }
  0x9c   :  { %990 = vmatpush1.bf16.msra.mxu0 %v2485_v1 }
  0x9d   :  { %991 = vmatprep.subr.bf16.mxu0 %v2488_v2  ;;  %v2788_v2 = vld [vmem:[#allocation2 + $0x324] ss:$8 sps:$4 sm:$0xff]  }
  0x9e   :  { %3239 = vst [vmem:[#allocation45_spill] sm:$0xff] %v2788_v2 }
  0xa0   :  { %992 = vmatpush1.bf16.msra.mxu0 %v2491_v3  ;;  %v2782_v3 = vld [vmem:[#allocation2 + $0x314] ss:$8 sps:$4 sm:$0xff]  }
  0xa1   :  { %993 = vmatprep.subr.bf16.mxu0 %v2494_v4  ;;  %v2779_v4 = vld [vmem:[#allocation2 + $0x300] ss:$8 sps:$4 sm:$0xff]  }
  0xa2   :  { %3237 = vst [vmem:[#allocation43_spill] sm:$0xff] %v2779_v4 }
  0xa4   :  { %994 = vmatpush1.bf16.msra.mxu0 %v2497_v5  ;;  %v2773_v5 = vld [vmem:[#allocation2 + $0x304] ss:$8 sps:$4 sm:$0xff]  }
  0xa5   :  { %1004 = vmatprep.subr.bf16.mxu0 %v2503_v7  ;;  %v259_v7 = vld [vmem:[%s3129_s0 + $0x20] sm:$0xff] }
  0xa7   :  { %996 = vmatmul.mubr.bf16.vlgmr.msra.gmra.mrb[0].mxu0 %v265_v9  ;;  %v2648_v9 = vld [vmem:[%s3133_s4 + $0x70] ss:$8 sps:$4 sm:$0xff]  }
  0xa8   :  { %1005 = vmatpush1.bf16.msra.mxu0 %v2509_v10  ;;  %1036 = vmatprep.mubr.bf16.mxu0 %v268_v11  ;;  %v2654_v11 = vld [vmem:[%s3133_s4 + $0x84] ss:$8 sps:$4 sm:$0xff]   ;;  %v2760_v10 = vld [vmem:[#allocation2 + $0x2e0] ss:$8 sps:$4 sm:$0xff]  }
  0xa9   :  { %1006 = vmatprep.subr.bf16.mxu0 %v2512_v12  ;;  %1276 = vmatpush1.bf16.msra.mxu1 %v2648_v9  ;;  %v2756_v12 = vld [vmem:[%s3133_s4 + $0xd0] ss:$8 sps:$4 sm:$0xff]   ;;  %3235 = vst [vmem:[#allocation41_spill] sm:$0xff] %v2760_v10 }
  0xaa   :  { %1277 = vmatprep.subr.bf16.mxu1 %v2654_v11 }
  0xac   :  { %1007 = vmatpush1.bf16.msra.mxu0 %v2530_v16  ;;  %v2744_v16 = vld [vmem:[%s3133_s4 + $0xd4] ss:$8 sps:$4 sm:$0xff]  }
  0xad   :  { %1008 = vmatprep.subr.bf16.mxu0 %v2533_v17  ;;  %v2738_v17 = vld [vmem:[%s3133_s4 + $0xc0] ss:$8 sps:$4 sm:$0xff]  }
  0xb0   :  { %1009 = vmatpush1.bf16.msra.mxu0 %v2549_v20  ;;  %v2726_v20 = vld [vmem:[%s3133_s4 + $0xc4] ss:$8 sps:$4 sm:$0xff]  }
  0xb1   :  { %1010 = vmatprep.subr.bf16.mxu0 %v2552_v21  ;;  %v2720_v21 = vld [vmem:[%s3133_s4 + $0xb0] ss:$8 sps:$4 sm:$0xff]  }
  0xb4   :  { %1011 = vmatpush1.bf16.msra.mxu0 %v2567_v24  ;;  %v2708_v24 = vld [vmem:[%s3133_s4 + $0xb4] ss:$8 sps:$4 sm:$0xff]  }
  0xb5   :  { %1012 = vmatprep.subr.bf16.mxu0 %v2570_v25  ;;  %v2702_v25 = vld [vmem:[%s3133_s4 + $0xa0] ss:$8 sps:$4 sm:$0xff]  }
  0xb8   :  { %1013 = vmatpush1.bf16.msra.mxu0 %v2585_v28  ;;  %v2690_v28 = vld [vmem:[%s3133_s4 + $0xa4] ss:$8 sps:$4 sm:$0xff]  }
  0xb9   :  { %1014 = vmatprep.subr.bf16.mxu0 %v2588_v29  ;;  %v2684_v29 = vld [vmem:[%s3133_s4 + $0x90] ss:$8 sps:$4 sm:$0xff]  }
  0xbc   :  { %1015 = vmatpush1.bf16.msra.mxu0 %v2603_v32  ;;  %v2672_v32 = vld [vmem:[%s3133_s4 + $0x94] ss:$8 sps:$4 sm:$0xff]  }
  0xbd   :  { %1016 = vmatprep.subr.bf16.mxu0 %v2606_v33  ;;  %v2666_v33 = vld [vmem:[%s3133_s4 + $0x80] ss:$8 sps:$4 sm:$0xff]  }
  0xbe   :  { %1278 = vmatpush1.bf16.msra.mxu1 %v2666_v33 }
  0xbf   :  { %1279 = vmatprep.subr.bf16.mxu1 %v2672_v32 }
  0xc0   :  { %1017 = vmatpush1.bf16.msra.mxu0 %v2621_v36  ;;  %v2657_v36 = vld [vmem:[#allocation2 + $0x280] ss:$8 sps:$4 sm:$0xff]  }
  0xc1   :  { %1018 = vmatprep.subr.bf16.mxu0 %v2624_v37  ;;  %3223 = vst [vmem:[#allocation29_spill] sm:$0xff] %v2657_v36  ;;  %v2660_v37 = vld [vmem:[#allocation2 + $0x294] ss:$8 sps:$4 sm:$0xff]  }
  0xc2   :  { %3224 = vst [vmem:[#allocation30_spill] sm:$0xff] %v2660_v37  ;;  %1280 = vmatpush1.bf16.msra.mxu1 %v2684_v29 }
  0xc3   :  { %1281 = vmatprep.subr.bf16.mxu1 %v2690_v28 }
  0xc4   :  { %1019 = vmatpush1.bf16.msra.mxu0 %v2639_v6  ;;  %v2675_v6 = vld [vmem:[#allocation2 + $0x290] ss:$8 sps:$4 sm:$0xff]  }
  0xc5   :  { %1020 = vmatprep.subr.bf16.mxu0 %v2642_v8  ;;  %3225 = vst [vmem:[#allocation31_spill] sm:$0xff] %v2675_v6  ;;  %v2678_v8 = vld [vmem:[#allocation2 + $0x2a4] ss:$8 sps:$4 sm:$0xff]  }
  0xc6   :  { %3226 = vst [vmem:[#allocation32_spill] sm:$0xff] %v2678_v8  ;;  %1282 = vmatpush1.bf16.msra.mxu1 %v2702_v25 }
  0xc7   :  { %1283 = vmatprep.subr.bf16.mxu1 %v2708_v24 }
  0xc8   :  { %1021 = vmatpush1.bf16.msra.mxu0 %v2657_v36  ;;  %v2693_v36 = vld [vmem:[#allocation2 + $0x2a0] ss:$8 sps:$4 sm:$0xff]  }
  0xc9   :  { %1022 = vmatprep.subr.bf16.mxu0 %v2660_v37  ;;  %3227 = vst [vmem:[#allocation33_spill] sm:$0xff] %v2693_v36  ;;  %v2696_v37 = vld [vmem:[#allocation2 + $0x2b4] ss:$8 sps:$4 sm:$0xff]  }
  0xca   :  { %3228 = vst [vmem:[#allocation34_spill] sm:$0xff] %v2696_v37  ;;  %1284 = vmatpush1.bf16.msra.mxu1 %v2720_v21 }
  0xcb   :  { %1285 = vmatprep.subr.bf16.mxu1 %v2726_v20 }
  0xcc   :  { %1023 = vmatpush1.bf16.msra.mxu0 %v2675_v6  ;;  %v2711_v6 = vld [vmem:[#allocation2 + $0x2b0] ss:$8 sps:$4 sm:$0xff]  }
  0xcd   :  { %1024 = vmatprep.subr.bf16.mxu0 %v2678_v8  ;;  %3229 = vst [vmem:[#allocation35_spill] sm:$0xff] %v2711_v6  ;;  %v2714_v8 = vld [vmem:[#allocation2 + $0x2c4] ss:$8 sps:$4 sm:$0xff]  }
  0xce   :  { %3230 = vst [vmem:[#allocation36_spill] sm:$0xff] %v2714_v8  ;;  %1286 = vmatpush1.bf16.msra.mxu1 %v2738_v17 }
  0xcf   :  { %1287 = vmatprep.subr.bf16.mxu1 %v2744_v16 }
  0xd0   :  { %1025 = vmatpush1.bf16.msra.mxu0 %v2693_v36  ;;  %v2729_v36 = vld [vmem:[#allocation2 + $0x2c0] ss:$8 sps:$4 sm:$0xff]  }
  0xd1   :  { %1026 = vmatprep.subr.bf16.mxu0 %v2696_v37  ;;  %3231 = vst [vmem:[#allocation37_spill] sm:$0xff] %v2729_v36  ;;  %v2732_v37 = vld [vmem:[#allocation2 + $0x2d4] ss:$8 sps:$4 sm:$0xff]  }
  0xd2   :  { %3232 = vst [vmem:[#allocation38_spill] sm:$0xff] %v2732_v37  ;;  %1288 = vmatpush1.bf16.msra.mxu1 %v2756_v12 }
  0xd4   :  { %1027 = vmatpush1.bf16.msra.mxu0 %v2711_v6  ;;  %v2747_v6 = vld [vmem:[#allocation2 + $0x2d0] ss:$8 sps:$4 sm:$0xff]  }
  0xd5   :  { %1028 = vmatprep.subr.bf16.mxu0 %v2714_v8  ;;  %3233 = vst [vmem:[#allocation39_spill] sm:$0xff] %v2747_v6  ;;  %v2750_v8 = vld [vmem:[#allocation2 + $0x2e4] ss:$8 sps:$4 sm:$0xff]  }
  0xd6   :  { %3234 = vst [vmem:[#allocation40_spill] sm:$0xff] %v2750_v8 }
  0xd8   :  { %1029 = vmatpush1.bf16.msra.mxu0 %v2729_v36  ;;  %v2763_v36 = vld [vmem:[#allocation2 + $0x2f4] ss:$8 sps:$4 sm:$0xff]  }
  0xd9   :  { %1030 = vmatprep.subr.bf16.mxu0 %v2732_v37  ;;  %3236 = vst [vmem:[#allocation42_spill] sm:$0xff] %v2763_v36  ;;  %v2767_v37 = vld [vmem:[#allocation2 + $0x2f0] ss:$8 sps:$4 sm:$0xff]  }
  0xdc   :  { %1031 = vmatpush1.bf16.msra.mxu0 %v2747_v6  ;;  %v267_v6 = vpack.c.bf16 %v259_v7, %v259_v7  ;;  %v2791_v7 = vld [vmem:[#allocation2 + $0x320] ss:$8 sps:$4 sm:$0xff]  }
  0xdd   :  { %1032 = vmatprep.subr.bf16.mxu0 %v2750_v8  ;;  %v262_v8 = vld [vmem:[%s3129_s0 + $0x38] sm:$0xff]  ;;  %3240 = vst [vmem:[#allocation46_spill] sm:$0xff] %v2791_v7 }
  0xe0   :  { %1033 = vmatpush1.bf16.msra.mxu0 %v2760_v10  ;;  %v270_v10 = vpack.c.bf16 %v262_v8, %v262_v8  ;;  %v2794_v8 = vld [vmem:[#allocation2 + $0x334] ss:$8 sps:$4 sm:$0xff]  }
  0xe1   :  { %1034 = vmatprep.subr.bf16.mxu0 %v2763_v36  ;;  %v2785_v36 = vld [vmem:[#allocation2 + $0x310] ss:$8 sps:$4 sm:$0xff]   ;;  %3241 = vst [vmem:[#allocation47_spill] sm:$0xff] %v2794_v8 }
  0xe2   :  { %3238 = vst [vmem:[#allocation44_spill] sm:$0xff] %v2785_v36 }
  0xe4   :  { %1035 = vmatpush1.bf16.msra.mxu0 %v2767_v37 }
  0xe5   :  { %1045 = vmatprep.subr.bf16.mxu0 %v2773_v5 }
  0xe7   :  { %1037 = vmatmul.mubr.bf16.vlgmr.msra.gmra.mrb[0].mxu0 %v267_v6  ;;  %v2797_v6 = vld [vmem:[#allocation2 + $0x330] ss:$8 sps:$4 sm:$0xff]  }
  0xe8   :  { %1046 = vmatpush1.bf16.msra.mxu0 %v2779_v4  ;;  %1077 = vmatprep.mubr.bf16.mxu0 %v270_v10  ;;  %3242 = vst [vmem:[#allocation48_spill] sm:$0xff] %v2797_v6  ;;  %v2800_v4 = vld [vmem:[#allocation2 + $0x344] ss:$8 sps:$4 sm:$0xff]   ;;  %v2803_v10 = vld [vmem:[#allocation2 + $0x340] ss:$8 sps:$4 sm:$0xff]  }
  0xe9   :  { %1047 = vmatprep.subr.bf16.mxu0 %v2782_v3  ;;  %3243 = vst [vmem:[#allocation49_spill] sm:$0xff] %v2800_v4  ;;  %3244 = vst [vmem:[#allocation50_spill] sm:$0xff] %v2803_v10 }
  0xec   :  { %1048 = vmatpush1.bf16.msra.mxu0 %v2785_v36  ;;  %v2806_v36 = vld [vmem:[#allocation2 + $0x354] ss:$8 sps:$4 sm:$0xff]  }
  0xed   :  { %1049 = vmatprep.subr.bf16.mxu0 %v2788_v2  ;;  %3245 = vst [vmem:[#allocation51_spill] sm:$0xff] %v2806_v36  ;;  %v2809_v2 = vld [vmem:[#allocation2 + $0x350] ss:$8 sps:$4 sm:$0xff]  }
  0xee   :  { %3246 = vst [vmem:[#allocation52_spill] sm:$0xff] %v2809_v2 }
  0xf0   :  { %1050 = vmatpush1.bf16.msra.mxu0 %v2791_v7  ;;  %v2812_v7 = vld [vmem:[#allocation2 + $0x364] ss:$8 sps:$4 sm:$0xff]  }
  0xf1   :  { %1051 = vmatprep.subr.bf16.mxu0 %v2794_v8  ;;  %3247 = vst [vmem:[#allocation53_spill] sm:$0xff] %v2812_v7  ;;  %v2815_v8 = vld [vmem:[#allocation2 + $0x360] ss:$8 sps:$4 sm:$0xff]  }
  0xf2   :  { %3248 = vst [vmem:[#allocation54_spill] sm:$0xff] %v2815_v8 }
  0xf4   :  { %1052 = vmatpush1.bf16.msra.mxu0 %v2797_v6  ;;  %v2818_v6 = vld [vmem:[#allocation2 + $0x374] ss:$8 sps:$4 sm:$0xff]  }
  0xf5   :  { %1053 = vmatprep.subr.bf16.mxu0 %v2800_v4  ;;  %3249 = vst [vmem:[#allocation55_spill] sm:$0xff] %v2818_v6  ;;  %v2821_v4 = vld [vmem:[#allocation2 + $0x370] ss:$8 sps:$4 sm:$0xff]  }
  0xf6   :  { %3250 = vst [vmem:[#allocation56_spill] sm:$0xff] %v2821_v4 }
  0xf8   :  { %1054 = vmatpush1.bf16.msra.mxu0 %v2803_v10  ;;  %v2824_v10 = vld [vmem:[#allocation2 + $0x384] ss:$8 sps:$4 sm:$0xff]  }
  0xf9   :  { %1055 = vmatprep.subr.bf16.mxu0 %v2806_v36  ;;  %3251 = vst [vmem:[#allocation57_spill] sm:$0xff] %v2824_v10  ;;  %v2827_v36 = vld [vmem:[#allocation2 + $0x380] ss:$8 sps:$4 sm:$0xff]  }
  0xfa   :  { %3252 = vst [vmem:[#allocation58_spill] sm:$0xff] %v2827_v36 }
  0xfc   :  { %1056 = vmatpush1.bf16.msra.mxu0 %v2809_v2  ;;  %v2830_v2 = vld [vmem:[#allocation2 + $0x394] ss:$8 sps:$4 sm:$0xff]  }
  0xfd   :  { %1057 = vmatprep.subr.bf16.mxu0 %v2812_v7  ;;  %3253 = vst [vmem:[#allocation59_spill] sm:$0xff] %v2830_v2  ;;  %v2833_v7 = vld [vmem:[#allocation2 + $0x390] ss:$8 sps:$4 sm:$0xff]  }
  0xfe   :  { %3254 = vst [vmem:[#allocation60_spill] sm:$0xff] %v2833_v7 }
 0x100   :  { %1058 = vmatpush1.bf16.msra.mxu0 %v2815_v8  ;;  %v2836_v8 = vld [vmem:[#allocation2 + $0x3a4] ss:$8 sps:$4 sm:$0xff]  }
 0x101   :  { %1059 = vmatprep.subr.bf16.mxu0 %v2818_v6  ;;  %3255 = vst [vmem:[#allocation61_spill] sm:$0xff] %v2836_v8  ;;  %v2839_v6 = vld [vmem:[#allocation2 + $0x3a0] ss:$8 sps:$4 sm:$0xff]  }
 0x102   :  { %3256 = vst [vmem:[#allocation62_spill] sm:$0xff] %v2839_v6 }
 0x104   :  { %1060 = vmatpush1.bf16.msra.mxu0 %v2821_v4  ;;  %v2842_v4 = vld [vmem:[#allocation2 + $0x3b4] ss:$8 sps:$4 sm:$0xff]  }
 0x105   :  { %1061 = vmatprep.subr.bf16.mxu0 %v2824_v10  ;;  %3257 = vst [vmem:[#allocation63_spill] sm:$0xff] %v2842_v4  ;;  %v2845_v10 = vld [vmem:[#allocation2 + $0x3b0] ss:$8 sps:$4 sm:$0xff]  }
 0x106   :  { %3258 = vst [vmem:[#allocation64_spill] sm:$0xff] %v2845_v10 }
 0x108   :  { %1062 = vmatpush1.bf16.msra.mxu0 %v2827_v36  ;;  %v2848_v36 = vld [vmem:[#allocation2 + $0x3c4] ss:$8 sps:$4 sm:$0xff]  }
 0x109   :  { %1063 = vmatprep.subr.bf16.mxu0 %v2830_v2  ;;  %3259 = vst [vmem:[#allocation65_spill] sm:$0xff] %v2848_v36  ;;  %v2851_v2 = vld [vmem:[#allocation2 + $0x3c0] ss:$8 sps:$4 sm:$0xff]  }
 0x10a   :  { %3260 = vst [vmem:[#allocation66_spill] sm:$0xff] %v2851_v2 }
 0x10c   :  { %1064 = vmatpush1.bf16.msra.mxu0 %v2833_v7  ;;  %v2854_v7 = vld [vmem:[#allocation2 + $0x3d4] ss:$8 sps:$4 sm:$0xff]  }
 0x10d   :  { %1065 = vmatprep.subr.bf16.mxu0 %v2836_v8  ;;  %3261 = vst [vmem:[#allocation67_spill] sm:$0xff] %v2854_v7  ;;  %v2857_v8 = vld [vmem:[#allocation2 + $0x3d0] ss:$8 sps:$4 sm:$0xff]  }
 0x110   :  { %1066 = vmatpush1.bf16.msra.mxu0 %v2839_v6  ;;  %v2860_v6 = vld [vmem:[#allocation2 + $0x3e4] ss:$8 sps:$4 sm:$0xff]  }
 0x111   :  { %1067 = vmatprep.subr.bf16.mxu0 %v2842_v4  ;;  %v2863_v4 = vld [vmem:[#allocation2 + $0x3e0] ss:$8 sps:$4 sm:$0xff]  }
 0x114   :  { %1068 = vmatpush1.bf16.msra.mxu0 %v2845_v10  ;;  %v2866_v10 = vld [vmem:[#allocation2 + $0x3f4] ss:$8 sps:$4 sm:$0xff]  }
 0x115   :  { %1069 = vmatprep.subr.bf16.mxu0 %v2848_v36  ;;  %v2869_v36 = vld [vmem:[#allocation2 + $0x3f0] ss:$8 sps:$4 sm:$0xff]  }
 0x118   :  { %1070 = vmatpush1.bf16.msra.mxu0 %v2851_v2  ;;  %v261_v2 = vld [vmem:[%s3129_s0 + $0x30] sm:$0xff] }
 0x119   :  { %1071 = vmatprep.subr.bf16.mxu0 %v2854_v7  ;;  %v269_v7 = vpack.c.bf16 %v261_v2, %v261_v2  ;;  %v2218_v2 = vld [vmem:[%s3133_s4 + $0xe4] ss:$8 sps:$4 sm:$0xff]  }
 0x11a   :  { %1289 = vmatprep.subr.bf16.mxu1 %v2218_v2 }
 0x11c   :  { %1072 = vmatpush1.bf16.msra.mxu0 %v2857_v8 }
 0x11d   :  { %1073 = vmatprep.subr.bf16.mxu0 %v2860_v6 }
 0x120   :  { %1074 = vmatpush1.bf16.msra.mxu0 %v2863_v4 }
 0x121   :  { %1075 = vmatprep.subr.bf16.mxu0 %v2866_v10 }
 0x124   :  { %1076 = vmatpush1.bf16.msra.mxu0 %v2869_v36 }
 0x125   :  { %1633 = vmatprep.subr.bf16.mxu0 %v2517_v13  ;;  %v2220_v13 = vld [vmem:[%s3133_s4 + $0xe0] ss:$8 sps:$4 sm:$0xff]  }
 0x126   :  { %1290 = vmatpush1.bf16.msra.mxu1 %v2220_v13 }
 0x127   :  { %1078 = vmatmul.mubr.bf16.vlgmr.msra.gmra.mrb[0].mxu0 %v269_v7  ;;  %v2945_v7 = vld [vmem:[#allocation4 + $0x60] sm:$0xff]  }
 0x128   :  { %1634 = vmatpush1.bf16.msra.mxu0 %v2522_v14  ;;  %v2221_v14 = vld [vmem:[%s3133_s4 + $0xf4] ss:$8 sps:$4 sm:$0xff]  }
 0x129   :  { %1635 = vmatprep.subr.bf16.mxu0 %v2527_v15  ;;  %1291 = vmatprep.subr.bf16.mxu1 %v2221_v14  ;;  %v2224_v15 = vld [vmem:[#allocation4 + $0x40] sm:$0xff]  }
 0x12c   :  { %1636 = vmatpush1.bf16.msra.mxu0 %v2540_v18 }
 0x12d   :  { %1637 = vmatprep.subr.bf16.mxu0 %v2546_v19  ;;  %v188_v19 = vld [vmem:[%s3132_s3] sm:$0x3] }
 0x130   :  { %1638 = vmatpush1.bf16.msra.mxu0 %v2558_v22 }
 0x131   :  { %1639 = vmatprep.subr.bf16.mxu0 %v2564_v23 }
 0x134   :  { %1640 = vmatpush1.bf16.msra.mxu0 %v2576_v26 }
 0x135   :  { %1641 = vmatprep.subr.bf16.mxu0 %v2582_v27 }
 0x138   :  { %1642 = vmatpush1.bf16.msra.mxu0 %v2594_v30 }
 0x139   :  { %1643 = vmatprep.subr.bf16.mxu0 %v2600_v31 }
 0x13c   :  { %1644 = vmatpush1.bf16.msra.mxu0 %v2612_v34  ;;  %v2927_v34 = vld [vmem:[#allocation4 + $0x48] sm:$0xff]  }
 0x13d   :  { %1645 = vmatprep.subr.bf16.mxu0 %v2618_v35  ;;  %v2930_v35 = vld [vmem:[#allocation4 + $0x8] sm:$0xff]  }
 0x140   :  { %1646 = vmatpush1.bf16.msra.mxu0 %v2630_v38  ;;  %v2933_v38 = vld [vmem:[#allocation4 + $0x50] sm:$0xff]  }
 0x141   :  { %1647 = vmatprep.subr.bf16.mxu0 %v2636_v39  ;;  %v2936_v39 = vld [vmem:[#allocation4 + $0x10] sm:$0xff]  }
 0x144   :  { %1648 = vmatpush1.bf16.msra.mxu0 %v2648_v9  ;;  %v2939_v9 = vld [vmem:[#allocation4 + $0x58] sm:$0xff]  }
 0x145   :  { %1649 = vmatprep.subr.bf16.mxu0 %v2654_v11  ;;  %v2942_v11 = vld [vmem:[#allocation4 + $0x18] sm:$0xff]  }
 0x148   :  { %1650 = vmatpush1.bf16.msra.mxu0 %v2666_v33 }
 0x149   :  { %1651 = vmatprep.subr.bf16.mxu0 %v2672_v32  ;;  %v2925_v32 = vld [vmem:[#allocation4] sm:$0xff]  }
 0x14c   :  { %1652 = vmatpush1.bf16.msra.mxu0 %v2684_v29 }
 0x14d   :  { %1653 = vmatprep.subr.bf16.mxu0 %v2690_v28 }
 0x150   :  { %1654 = vmatpush1.bf16.msra.mxu0 %v2702_v25 }
 0x151   :  { %1655 = vmatprep.subr.bf16.mxu0 %v2708_v24 }
 0x154   :  { %1656 = vmatpush1.bf16.msra.mxu0 %v2720_v21 }
 0x155   :  { %1657 = vmatprep.subr.bf16.mxu0 %v2726_v20 }
 0x158   :  { %1658 = vmatpush1.bf16.msra.mxu0 %v2738_v17 }
 0x159   :  { %1659 = vmatprep.subr.bf16.mxu0 %v2744_v16  ;;  %v272_v16 = vlaneseq }
 0x15b   :  { %v273_v17 = vshrl.u32 %v272_v16, 7  ;;  %v2964_v16 = vld [vmem:[#allocation4 + $0x78] sm:$0xff]  }
 0x15c   :  { %1660 = vmatpush1.bf16.msra.mxu0 %v2756_v12  ;;  %v2223_v12 = vld [vmem:[%s3133_s4 + $0xf0] ss:$8 sps:$4 sm:$0xff]   ;;  %3263 = vst [vmem:[#allocation69_spill] sm:$0xff] %v2964_v16 }
 0x15d   :  { %1661 = vmatprep.subr.bf16.mxu0 %v2218_v2  ;;  %1292 = vmatpush1.bf16.msra.mxu1 %v2223_v12  ;;  %v274_v18 = vsub.s32 0, %v273_v17  ;;  %v278_v20 = vsub.s32 1, %v273_v17  ;;  %v2948_v2 = vld [vmem:[#allocation4 + $0x20] sm:$0xff]   ;;  %v2966_v17 = vld [vmem:[#allocation4 + $0x38] sm:$0xff]  }
 0x15e   :  { %1906 = vmatprep.subr.bf16.mxu1 %v2224_v15  ;;  %3264 = vst [vmem:[#allocation70_spill] sm:$0xff] %v2966_v17 }
 0x15f   :  { %v2919_v21 = vrot.slane %v188_v19, %v274_v18  ;;  %v2921_v22 = vrot.slane %v188_v19, %v278_v20  ;;  %v2240_v19 = vld [vmem:[#allocation2 + $0x4] ss:$8 sps:$4 sm:$0xff]  }
 0x160   :  { %1662 = vmatpush1.bf16.msra.mxu0 %v2220_v13  ;;  %v2951_v13 = vld [vmem:[#allocation4 + $0x68] sm:$0xff]  }
 0x161   :  { %1663 = vmatprep.subr.bf16.mxu0 %v2221_v14  ;;  %v2954_v14 = vld [vmem:[#allocation4 + $0x28] sm:$0xff]  }
 0x164   :  { %1664 = vmatpush1.bf16.msra.mxu0 %v2223_v12  ;;  %v2958_v12 = vld [vmem:[#allocation4 + $0x70] sm:$0xff]  }
 0x165   :  { %1928 = vmatprep.subr.bf16.mxu0 %v2224_v15  ;;  %v2960_v15 = vld [vmem:[#allocation4 + $0x30] sm:$0xff]  }
 0x166   :  { %3262 = vst [vmem:[#allocation68_spill] sm:$0xff] %v2960_v15 }
 0x1fa   :  { %v1079_v23 = vpop.f32.mrb[0].mxu0 }
 0x1fb   :  { %v1950_v24 = vadd.f32 %v1079_v23, %v2919_v21  ;;  %v1081_v25 = vpop.f32.mrb[1].mxu0  ;;  %v221_v23 = vld [vmem:[%s3134_s5] sm:$0x3] }
 0x1fc   :  { %v1951_v26 = vadd.f32 %v1081_v25, %v2921_v22  ;;  %v1083_v27 = vpop.f32.mrb[2].mxu0  ;;  %v2975_v25 = vrot.slane %v221_v23, %v278_v20  ;;  %v2241_v20 = vld [vmem:[#allocation2] ss:$8 sps:$4 sm:$0xff]  }
 0x1fd   :  { %v1086_v28 = vmax.f32 %v1950_v24, 0.0  ;;  %v1084_v29 = vpop.f32.mrb[3].mxu0  ;;  %v2973_v24 = vrot.slane %v221_v23, %v274_v18  ;;  %v2242_v23 = vld [vmem:[#allocation2 + $0x14] ss:$8 sps:$4 sm:$0xff]  }
 0x1fe   :  { %v1087_v30 = vmax.f32 %v1951_v26, 0.0 }
 0x1ff   :  { %v1088_v33 = vpack.c.bf16 %v1086_v28, %v1086_v28 }
 0x200   :  { %v1089_v31 = vpack.c.bf16 %v1087_v30, %v1087_v30 }
 0x202   :  { %1293 = vmatprep.mubr.bf16.mxu1 %v1089_v31 }
 0x203   :  { %1294 = vmatmul.mubr.bf16.vlgmr.msra.gmra.mrb[0].mxu1 %v1088_v33 }
 0x204   :  { %1907 = vmatpush3.bf16.msra.mxu1 %v2925_v32 }
 0x205   :  { %1908 = vmatprep.subr.bf16.mxu1 %v2927_v34 }
 0x208   :  { %1909 = vmatpush3.bf16.msra.mxu1 %v2930_v35 }
 0x209   :  { %1910 = vmatprep.subr.bf16.mxu1 %v2933_v38 }
 0x20c   :  { %1911 = vmatpush3.bf16.msra.mxu1 %v2936_v39 }
 0x20d   :  { %1912 = vmatprep.subr.bf16.mxu1 %v2939_v9 }
 0x210   :  { %1913 = vmatpush3.bf16.msra.mxu1 %v2942_v11 }
 0x211   :  { %1914 = vmatprep.subr.bf16.mxu1 %v2945_v7 }
 0x214   :  { %1915 = vmatpush3.bf16.msra.mxu1 %v2948_v2 }
 0x215   :  { %1916 = vmatprep.subr.bf16.mxu1 %v2951_v13 }
 0x218   :  { %1917 = vmatpush3.bf16.msra.mxu1 %v2954_v14 }
 0x219   :  { %1918 = vmatprep.subr.bf16.mxu1 %v2958_v12 }
 0x21c   :  { %1919 = vmatpush3.bf16.msra.mxu1 %v2960_v15 }
 0x21d   :  { %1920 = vmatprep.subr.bf16.mxu1 %v2964_v16 }
 0x220   :  { %1921 = vmatpush3.bf16.msra.mxu1 %v2966_v17 }
 0x221   :  { %1465 = vmatprep.subr.bf16.mxu1 %v2240_v19  ;;  %v1450_v19 = vld [vmem:[%s3130_s1 + $0x8] sm:$0xff] }
 0x222   :  { %v1458_v15 = vpack.c.bf16 %v1450_v19, %v1450_v19  ;;  %v2253_v19 = vld [vmem:[#allocation2 + $0x60] ss:$8 sps:$4 sm:$0xff]  }
 0x2d6   :  { %v1295_v26 = vpop.f32.mrb[0].mxu1 }
 0x2d7   :  { %v1296_v27 = vadd.f32 %v1295_v26, %v2973_v24  ;;  %v1297_v28 = vpop.f32.mrb[1].mxu1  ;;  %v2243_v26 = vld [vmem:[#allocation2 + $0x10] ss:$8 sps:$4 sm:$0xff]  }
 0x2d8   :  { %v1298_v29 = vadd.f32 %v1297_v28, %v2975_v25  ;;  %v1299_v30 = vpop.f32.mrb[2].mxu1  ;;  %v2244_v28 = vld [vmem:[#allocation2 + $0x24] ss:$8 sps:$4 sm:$0xff]  }
 0x2d9   :  { %v1302_v31 = vmax.f32 %v1296_v27, 0.0  ;;  %v1300_v33 = vpop.f32.mrb[3].mxu1  ;;  %v2245_v27 = vld [vmem:[#allocation2 + $0x20] ss:$8 sps:$4 sm:$0xff]   ;;  %v2246_v30 = vld [vmem:[#allocation2 + $0x34] ss:$8 sps:$4 sm:$0xff]  }
 0x2da   :  { %v1303_v17 = vmax.f32 %v1298_v29, 0.0  ;;  %v2247_v33 = vld [vmem:[#allocation2 + $0x30] ss:$8 sps:$4 sm:$0xff]   ;;  %v2249_v29 = vld [vmem:[#allocation2 + $0x40] ss:$8 sps:$4 sm:$0xff]  }
 0x2db   :  { %v1304_v18 = vpack.c.bf16 %v1302_v31, %v1302_v31  ;;  %v2251_v31 = vld [vmem:[#allocation2 + $0x50] ss:$8 sps:$4 sm:$0xff]  }
 0x2dc   :  { %v1305_v16 = vpack.c.bf16 %v1303_v17, %v1303_v17  ;;  %v2248_v17 = vld [vmem:[#allocation2 + $0x44] ss:$8 sps:$4 sm:$0xff]  }
 0x2de   :  { %1440 = vmatprep.mubr.bf16.mxu1 %v1305_v16  ;;  %v2250_v16 = vld [vmem:[#allocation2 + $0x54] ss:$8 sps:$4 sm:$0xff]  }
 0x2df   :  { %1441 = vmatmul.mubr.bf16.vlgmr.msra.gmra.mrb[4].mxu1 %v1304_v18  ;;  %v2254_v18 = vld [vmem:[#allocation2 + $0x74] ss:$8 sps:$4 sm:$0xff]  }
 0x2e0   :  { %1466 = vmatpush1.bf16.msra.mxu1 %v2241_v20  ;;  %1497 = vmatprep.mubr.bf16.mxu1 %v1458_v15  ;;  %v2252_v15 = vld [vmem:[#allocation2 + $0x64] ss:$8 sps:$4 sm:$0xff]   ;;  %v2255_v20 = vld [vmem:[#allocation2 + $0x70] ss:$8 sps:$4 sm:$0xff]  }
 0x2e1   :  { %1467 = vmatprep.subr.bf16.mxu1 %v2242_v23  ;;  %v2256_v23 = vld [vmem:[#allocation2 + $0x84] ss:$8 sps:$4 sm:$0xff]  }
 0x2e4   :  { %1468 = vmatpush1.bf16.msra.mxu1 %v2243_v26  ;;  %v2257_v26 = vld [vmem:[#allocation2 + $0x80] ss:$8 sps:$4 sm:$0xff]  }
 0x2e5   :  { %1469 = vmatprep.subr.bf16.mxu1 %v2244_v28  ;;  %v2258_v28 = vld [vmem:[#allocation2 + $0x94] ss:$8 sps:$4 sm:$0xff]  }
 0x2e8   :  { %1470 = vmatpush1.bf16.msra.mxu1 %v2245_v27  ;;  %v2259_v27 = vld [vmem:[#allocation2 + $0x90] ss:$8 sps:$4 sm:$0xff]  }
 0x2e9   :  { %1471 = vmatprep.subr.bf16.mxu1 %v2246_v30  ;;  %v2260_v30 = vld [vmem:[#allocation2 + $0xa4] ss:$8 sps:$4 sm:$0xff]  }
 0x2ec   :  { %1472 = vmatpush1.bf16.msra.mxu1 %v2247_v33  ;;  %v2261_v33 = vld [vmem:[#allocation2 + $0xa0] ss:$8 sps:$4 sm:$0xff]  }
 0x2ed   :  { %1473 = vmatprep.subr.bf16.mxu1 %v2248_v17  ;;  %v2262_v17 = vld [vmem:[#allocation2 + $0xb4] ss:$8 sps:$4 sm:$0xff]  }
 0x2f0   :  { %1474 = vmatpush1.bf16.msra.mxu1 %v2249_v29  ;;  %v2263_v29 = vld [vmem:[#allocation2 + $0xb0] ss:$8 sps:$4 sm:$0xff]  }
 0x2f1   :  { %1475 = vmatprep.subr.bf16.mxu1 %v2250_v16  ;;  %v2264_v16 = vld [vmem:[#allocation2 + $0xc4] ss:$8 sps:$4 sm:$0xff]  }
 0x2f4   :  { %1476 = vmatpush1.bf16.msra.mxu1 %v2251_v31  ;;  %v2265_v31 = vld [vmem:[#allocation2 + $0xc0] ss:$8 sps:$4 sm:$0xff]  }
 0x2f5   :  { %1477 = vmatprep.subr.bf16.mxu1 %v2252_v15  ;;  %v2266_v15 = vld [vmem:[#allocation2 + $0xd4] ss:$8 sps:$4 sm:$0xff]  }
 0x2f8   :  { %1478 = vmatpush1.bf16.msra.mxu1 %v2253_v19  ;;  %v2267_v19 = vld [vmem:[#allocation2 + $0xd0] ss:$8 sps:$4 sm:$0xff]  }
 0x2f9   :  { %1479 = vmatprep.subr.bf16.mxu1 %v2254_v18  ;;  %v2268_v18 = vld [vmem:[#allocation2 + $0xe4] ss:$8 sps:$4 sm:$0xff]  }
 0x2fc   :  { %1480 = vmatpush1.bf16.msra.mxu1 %v2255_v20  ;;  %v2269_v20 = vld [vmem:[#allocation2 + $0xe0] ss:$8 sps:$4 sm:$0xff]  }
 0x2fd   :  { %1481 = vmatprep.subr.bf16.mxu1 %v2256_v23  ;;  %v1449_v23 = vld [vmem:[%s3130_s1] sm:$0xff] }
 0x300   :  { %1482 = vmatpush1.bf16.msra.mxu1 %v2257_v26  ;;  %v2270_v26 = vld [vmem:[#allocation2 + $0xf4] ss:$8 sps:$4 sm:$0xff]  }
 0x301   :  { %1483 = vmatprep.subr.bf16.mxu1 %v2258_v28  ;;  %v1452_v28 = vld [vmem:[%s3130_s1 + $0x18] sm:$0xff] }
 0x304   :  { %1484 = vmatpush1.bf16.msra.mxu1 %v2259_v27  ;;  %v1457_v27 = vpack.c.bf16 %v1449_v23, %v1449_v23  ;;  %v3293_v23 = vld [vmem:[#allocation36_spill] sm:$0xff] }
 0x305   :  { %1485 = vmatprep.subr.bf16.mxu1 %v2260_v30  ;;  %v2271_v30 = vld [vmem:[#allocation2 + $0xf0] ss:$8 sps:$4 sm:$0xff]  }
 0x308   :  { %1486 = vmatpush1.bf16.msra.mxu1 %v2261_v33  ;;  %v1460_v33 = vpack.c.bf16 %v1452_v28, %v1452_v28  ;;  %v3295_v28 = vld [vmem:[#allocation38_spill] sm:$0xff] }
 0x309   :  { %1487 = vmatprep.subr.bf16.mxu1 %v2262_v17  ;;  %v2272_v17 = vld [vmem:[#allocation2 + $0x104] ss:$8 sps:$4 sm:$0xff]  }
 0x30c   :  { %1488 = vmatpush1.bf16.msra.mxu1 %v2263_v29  ;;  %v2273_v29 = vld [vmem:[#allocation2 + $0x100] ss:$8 sps:$4 sm:$0xff]  }
 0x30d   :  { %1489 = vmatprep.subr.bf16.mxu1 %v2264_v16  ;;  %v3287_v16 = vld [vmem:[#allocation30_spill] sm:$0xff] }
 0x310   :  { %1490 = vmatpush1.bf16.msra.mxu1 %v2265_v31  ;;  %v3288_v31 = vld [vmem:[#allocation31_spill] sm:$0xff] }
 0x311   :  { %1491 = vmatprep.subr.bf16.mxu1 %v2266_v15  ;;  %v3289_v15 = vld [vmem:[#allocation32_spill] sm:$0xff] }
 0x314   :  { %1492 = vmatpush1.bf16.msra.mxu1 %v2267_v19  ;;  %v3290_v19 = vld [vmem:[#allocation33_spill] sm:$0xff] }
 0x315   :  { %1493 = vmatprep.subr.bf16.mxu1 %v2268_v18  ;;  %v3291_v18 = vld [vmem:[#allocation34_spill] sm:$0xff] }
 0x318   :  { %1494 = vmatpush1.bf16.msra.mxu1 %v2269_v20  ;;  %v3292_v20 = vld [vmem:[#allocation35_spill] sm:$0xff] }
 0x319   :  { %1495 = vmatprep.subr.bf16.mxu1 %v2270_v26  ;;  %v3294_v26 = vld [vmem:[#allocation37_spill] sm:$0xff] }
 0x31c   :  { %1496 = vmatpush1.bf16.msra.mxu1 %v2271_v30  ;;  %v3297_v30 = vld [vmem:[#allocation40_spill] sm:$0xff] }
 0x31d   :  { %1506 = vmatprep.subr.bf16.mxu1 %v2272_v17  ;;  %v1453_v17 = vld [vmem:[%s3130_s1 + $0x20] sm:$0xff] }
 0x31f   :  { %1498 = vmatmul.mubr.bf16.vlgmr.msra.gmra.mrb[8].mxu1 %v1457_v27  ;;  %v3296_v27 = vld [vmem:[#allocation39_spill] sm:$0xff] }
 0x320   :  { %1507 = vmatpush1.bf16.msra.mxu1 %v2273_v29  ;;  %1538 = vmatprep.mubr.bf16.mxu1 %v1460_v33  ;;  %v3298_v33 = vld [vmem:[#allocation41_spill] sm:$0xff]  ;;  %v3299_v29 = vld [vmem:[#allocation42_spill] sm:$0xff] }
 0x321   :  { %1508 = vmatprep.subr.bf16.mxu1 %v2411_v40  ;;  %v3265_v40 = vld [vmem:[#allocation8_spill] sm:$0xff] }
 0x324   :  { %1509 = vmatpush1.bf16.msra.mxu1 %v2413_v41  ;;  %v3266_v41 = vld [vmem:[#allocation9_spill] sm:$0xff] }
 0x325   :  { %1510 = vmatprep.subr.bf16.mxu1 %v2416_v42  ;;  %v1451_v42 = vld [vmem:[%s3130_s1 + $0x10] sm:$0xff] }
 0x328   :  { %1511 = vmatpush1.bf16.msra.mxu1 %v2419_v43  ;;  %v3267_v43 = vld [vmem:[#allocation10_spill] sm:$0xff] }
 0x329   :  { %1512 = vmatprep.subr.bf16.mxu1 %v2421_v44  ;;  %v1454_v44 = vld [vmem:[%s3130_s1 + $0x28] sm:$0xff] }
 0x32c   :  { %1513 = vmatpush1.bf16.msra.mxu1 %v2425_v45  ;;  %v1459_v45 = vpack.c.bf16 %v1451_v42, %v1451_v42 }
 0x32d   :  { %1514 = vmatprep.subr.bf16.mxu1 %v2427_v46  ;;  %v3268_v46 = vld [vmem:[#allocation11_spill] sm:$0xff] }
 0x330   :  { %1515 = vmatpush1.bf16.msra.mxu1 %v2431_v47  ;;  %v1462_v47 = vpack.c.bf16 %v1454_v44, %v1454_v44  ;;  %v3301_v44 = vld [vmem:[#allocation44_spill] sm:$0xff] }
 0x331   :  { %1516 = vmatprep.subr.bf16.mxu1 %v2433_v48  ;;  %v3269_v48 = vld [vmem:[#allocation12_spill] sm:$0xff] }
 0x334   :  { %1517 = vmatpush1.bf16.msra.mxu1 %v2437_v49  ;;  %v3270_v49 = vld [vmem:[#allocation13_spill] sm:$0xff] }
 0x335   :  { %1518 = vmatprep.subr.bf16.mxu1 %v2439_v50  ;;  %v3271_v50 = vld [vmem:[#allocation14_spill] sm:$0xff] }
 0x338   :  { %1519 = vmatpush1.bf16.msra.mxu1 %v2443_v51  ;;  %v3272_v51 = vld [vmem:[#allocation15_spill] sm:$0xff] }
 0x339   :  { %1520 = vmatprep.subr.bf16.mxu1 %v2445_v52  ;;  %v3273_v52 = vld [vmem:[#allocation16_spill] sm:$0xff] }
 0x33c   :  { %1521 = vmatpush1.bf16.msra.mxu1 %v2449_v53  ;;  %v3274_v53 = vld [vmem:[#allocation17_spill] sm:$0xff] }
 0x33d   :  { %1522 = vmatprep.subr.bf16.mxu1 %v2451_v54  ;;  %v3275_v54 = vld [vmem:[#allocation18_spill] sm:$0xff] }
 0x340   :  { %1523 = vmatpush1.bf16.msra.mxu1 %v2455_v55  ;;  %v3276_v55 = vld [vmem:[#allocation19_spill] sm:$0xff] }
 0x341   :  { %1524 = vmatprep.subr.bf16.mxu1 %v2457_v56  ;;  %v3277_v56 = vld [vmem:[#allocation20_spill] sm:$0xff] }
 0x344   :  { %1525 = vmatpush1.bf16.msra.mxu1 %v2461_v57  ;;  %v3278_v57 = vld [vmem:[#allocation21_spill] sm:$0xff] }
 0x345   :  { %1526 = vmatprep.subr.bf16.mxu1 %v2463_v58  ;;  %v3279_v58 = vld [vmem:[#allocation22_spill] sm:$0xff] }
 0x348   :  { %1527 = vmatpush1.bf16.msra.mxu1 %v2467_v59  ;;  %v3280_v59 = vld [vmem:[#allocation23_spill] sm:$0xff] }
 0x349   :  { %1528 = vmatprep.subr.bf16.mxu1 %v2469_v60  ;;  %v3281_v60 = vld [vmem:[#allocation24_spill] sm:$0xff] }
 0x34c   :  { %1529 = vmatpush1.bf16.msra.mxu1 %v2473_v61  ;;  %v3282_v61 = vld [vmem:[#allocation25_spill] sm:$0xff] }
 0x34d   :  { %1530 = vmatprep.subr.bf16.mxu1 %v2476_v62  ;;  %v3283_v62 = vld [vmem:[#allocation26_spill] sm:$0xff] }
 0x350   :  { %1531 = vmatpush1.bf16.msra.mxu1 %v2479_v63  ;;  %v3284_v63 = vld [vmem:[#allocation27_spill] sm:$0xff] }
 0x351   :  { %1532 = vmatprep.subr.bf16.mxu1 %v2482_v0  ;;  %v3285_v0 = vld [vmem:[#allocation28_spill] sm:$0xff] }
 0x354   :  { %1533 = vmatpush1.bf16.msra.mxu1 %v2485_v1  ;;  %v3286_v1 = vld [vmem:[#allocation29_spill] sm:$0xff] }
 0x355   :  { %1534 = vmatprep.subr.bf16.mxu1 %v3265_v40  ;;  %v1456_v40 = vld [vmem:[%s3130_s1 + $0x38] sm:$0xff] }
 0x356   :  { %v1464_v42 = vpack.c.bf16 %v1456_v40, %v1456_v40 }
 0x358   :  { %1535 = vmatpush1.bf16.msra.mxu1 %v3266_v41  ;;  %v1461_v41 = vpack.c.bf16 %v1453_v17, %v1453_v17 }
 0x359   :  { %1536 = vmatprep.subr.bf16.mxu1 %v3267_v43  ;;  %v3300_v43 = vld [vmem:[#allocation43_spill] sm:$0xff] }
 0x35c   :  { %1537 = vmatpush1.bf16.msra.mxu1 %v3268_v46  ;;  %v3303_v46 = vld [vmem:[#allocation46_spill] sm:$0xff] }
 0x35d   :  { %1547 = vmatprep.subr.bf16.mxu1 %v3269_v48  ;;  %v3305_v48 = vld [vmem:[#allocation48_spill] sm:$0xff] }
 0x35f   :  { %1539 = vmatmul.mubr.bf16.vlgmr.msra.gmra.mrb[8].mxu1 %v1459_v45  ;;  %v3302_v45 = vld [vmem:[#allocation45_spill] sm:$0xff] }
 0x360   :  { %1548 = vmatpush1.bf16.msra.mxu1 %v3270_v49  ;;  %1579 = vmatprep.mubr.bf16.mxu1 %v1462_v47  ;;  %v3304_v47 = vld [vmem:[#allocation47_spill] sm:$0xff]  ;;  %v3307_v49 = vld [vmem:[#allocation50_spill] sm:$0xff] }
 0x361   :  { %1549 = vmatprep.subr.bf16.mxu1 %v3271_v50 }
 0x364   :  { %1550 = vmatpush1.bf16.msra.mxu1 %v3272_v51 }
 0x365   :  { %1551 = vmatprep.subr.bf16.mxu1 %v3273_v52 }
 0x368   :  { %1552 = vmatpush1.bf16.msra.mxu1 %v3274_v53  ;;  %v3309_v53 = vld [vmem:[#allocation52_spill] sm:$0xff] }
 0x369   :  { %1553 = vmatprep.subr.bf16.mxu1 %v3275_v54 }
 0x36c   :  { %1554 = vmatpush1.bf16.msra.mxu1 %v3276_v55 }
 0x36d   :  { %1555 = vmatprep.subr.bf16.mxu1 %v3277_v56  ;;  %v3310_v56 = vld [vmem:[#allocation53_spill] sm:$0xff] }
 0x370   :  { %1556 = vmatpush1.bf16.msra.mxu1 %v3278_v57 }
 0x371   :  { %1557 = vmatprep.subr.bf16.mxu1 %v3279_v58  ;;  %v3311_v58 = vld [vmem:[#allocation54_spill] sm:$0xff] }
 0x374   :  { %1558 = vmatpush1.bf16.msra.mxu1 %v3280_v59  ;;  %v3312_v59 = vld [vmem:[#allocation55_spill] sm:$0xff] }
 0x375   :  { %1559 = vmatprep.subr.bf16.mxu1 %v3281_v60  ;;  %v3313_v60 = vld [vmem:[#allocation56_spill] sm:$0xff] }
 0x378   :  { %1560 = vmatpush1.bf16.msra.mxu1 %v3282_v61  ;;  %v3314_v61 = vld [vmem:[#allocation57_spill] sm:$0xff] }
 0x379   :  { %1561 = vmatprep.subr.bf16.mxu1 %v3283_v62  ;;  %v3315_v62 = vld [vmem:[#allocation58_spill] sm:$0xff] }
 0x37c   :  { %1562 = vmatpush1.bf16.msra.mxu1 %v3284_v63  ;;  %v3316_v63 = vld [vmem:[#allocation59_spill] sm:$0xff] }
 0x37d   :  { %1563 = vmatprep.subr.bf16.mxu1 %v3285_v0  ;;  %v3317_v0 = vld [vmem:[#allocation60_spill] sm:$0xff] }
 0x380   :  { %1564 = vmatpush1.bf16.msra.mxu1 %v3286_v1  ;;  %v3318_v1 = vld [vmem:[#allocation61_spill] sm:$0xff] }
 0x381   :  { %1565 = vmatprep.subr.bf16.mxu1 %v3287_v16  ;;  %v3319_v16 = vld [vmem:[#allocation62_spill] sm:$0xff] }
 0x384   :  { %1566 = vmatpush1.bf16.msra.mxu1 %v3288_v31  ;;  %v3320_v31 = vld [vmem:[#allocation63_spill] sm:$0xff] }
 0x385   :  { %1567 = vmatprep.subr.bf16.mxu1 %v3289_v15  ;;  %v3321_v15 = vld [vmem:[#allocation64_spill] sm:$0xff] }
 0x388   :  { %1568 = vmatpush1.bf16.msra.mxu1 %v3290_v19  ;;  %v3322_v19 = vld [vmem:[#allocation65_spill] sm:$0xff] }
 0x389   :  { %1569 = vmatprep.subr.bf16.mxu1 %v3291_v18  ;;  %v3323_v18 = vld [vmem:[#allocation66_spill] sm:$0xff] }
 0x38c   :  { %1570 = vmatpush1.bf16.msra.mxu1 %v3292_v20  ;;  %v3324_v20 = vld [vmem:[#allocation67_spill] sm:$0xff] }
 0x38d   :  { %1571 = vmatprep.subr.bf16.mxu1 %v3293_v23  ;;  %v1455_v23 = vld [vmem:[%s3130_s1 + $0x30] sm:$0xff] }
 0x390   :  { %1572 = vmatpush1.bf16.msra.mxu1 %v3294_v26  ;;  %v1463_v26 = vpack.c.bf16 %v1455_v23, %v1455_v23 }
 0x391   :  { %1573 = vmatprep.subr.bf16.mxu1 %v3295_v28 }
 0x394   :  { %1574 = vmatpush1.bf16.msra.mxu1 %v3296_v27 }
 0x395   :  { %1575 = vmatprep.subr.bf16.mxu1 %v3297_v30 }
 0x398   :  { %1576 = vmatpush1.bf16.msra.mxu1 %v3298_v33 }
 0x399   :  { %1577 = vmatprep.subr.bf16.mxu1 %v3299_v29 }
 0x39c   :  { %1578 = vmatpush1.bf16.msra.mxu1 %v2767_v37  ;;  %v3306_v37 = vld [vmem:[#allocation49_spill] sm:$0xff] }
 0x39d   :  { %1588 = vmatprep.subr.bf16.mxu1 %v2773_v5  ;;  %v3308_v5 = vld [vmem:[#allocation51_spill] sm:$0xff] }
 0x39f   :  { %1580 = vmatmul.mubr.bf16.vlgmr.msra.gmra.mrb[8].mxu1 %v1461_v41 }
 0x3a0   :  { %1589 = vmatpush1.bf16.msra.mxu1 %v3300_v43  ;;  %1620 = vmatprep.mubr.bf16.mxu1 %v1464_v42 }
 0x3a1   :  { %1590 = vmatprep.subr.bf16.mxu1 %v2782_v3  ;;  %v3076_v3 = vld [vmem:[%s3136_s7] ss:$0 sm:$0xff] }
 0x3a4   :  { %1591 = vmatpush1.bf16.msra.mxu1 %v3301_v44 }
 0x3a5   :  { %1592 = vmatprep.subr.bf16.mxu1 %v3302_v45 }
 0x3a8   :  { %1593 = vmatpush1.bf16.msra.mxu1 %v3303_v46 }
 0x3a9   :  { %1594 = vmatprep.subr.bf16.mxu1 %v3304_v47 }
 0x3ac   :  { %1595 = vmatpush1.bf16.msra.mxu1 %v3305_v48 }
 0x3ad   :  { %1596 = vmatprep.subr.bf16.mxu1 %v3306_v37 }
 0x3b0   :  { %1597 = vmatpush1.bf16.msra.mxu1 %v3307_v49 }
 0x3b1   :  { %1598 = vmatprep.subr.bf16.mxu1 %v3308_v5 }
 0x3b2   :  { %v1922_v50 = vpop.f32.mrb[4].mxu1 }
 0x3b3   :  { %v1923_v51 = vpop.f32.mrb[5].mxu1 }
 0x3b4   :  { %v1924_v52 = vadd.f32 %v1923_v51, %v1922_v50  ;;  %1599 = vmatpush1.bf16.msra.mxu1 %v3309_v53  ;;  %v1925_v54 = vpop.f32.mrb[6].mxu1 }
 0x3b5   :  { %v1926_v55 = vpop.f32.mrb[7].mxu1  ;;  %1600 = vmatprep.subr.bf16.mxu1 %v3310_v56 }
 0x3b6   :  { %v1443_v57 = vadd.f32 %v1924_v52, %v3076_v3 }
 0x3b8   :  { %1448 = vst [vmem:[%s3137_s8] sm:$0xff] %v1443_v57  ;;  %1601 = vmatpush1.bf16.msra.mxu1 %v3311_v58 }
 0x3b9   :  { %1602 = vmatprep.subr.bf16.mxu1 %v3312_v59 }
 0x3bc   :  { %1603 = vmatpush1.bf16.msra.mxu1 %v3313_v60 }
 0x3bd   :  { %1604 = vmatprep.subr.bf16.mxu1 %v3314_v61 }
 0x3c0   :  { %1605 = vmatpush1.bf16.msra.mxu1 %v3315_v62 }
 0x3c1   :  { %1606 = vmatprep.subr.bf16.mxu1 %v3316_v63 }
 0x3c4   :  { %1607 = vmatpush1.bf16.msra.mxu1 %v3317_v0 }
 0x3c5   :  { %1608 = vmatprep.subr.bf16.mxu1 %v3318_v1 }
 0x3c8   :  { %1609 = vmatpush1.bf16.msra.mxu1 %v3319_v16 }
 0x3c9   :  { %1610 = vmatprep.subr.bf16.mxu1 %v3320_v31 }
 0x3cc   :  { %1611 = vmatpush1.bf16.msra.mxu1 %v3321_v15 }
 0x3cd   :  { %1612 = vmatprep.subr.bf16.mxu1 %v3322_v19 }
 0x3d0   :  { %1613 = vmatpush1.bf16.msra.mxu1 %v3323_v18 }
 0x3d1   :  { %1614 = vmatprep.subr.bf16.mxu1 %v3324_v20 }
 0x3d4   :  { %1615 = vmatpush1.bf16.msra.mxu1 %v2857_v8 }
 0x3d5   :  { %1616 = vmatprep.subr.bf16.mxu1 %v2860_v6 }
 0x3d8   :  { %1617 = vmatpush1.bf16.msra.mxu1 %v2863_v4 }
 0x3d9   :  { %1618 = vmatprep.subr.bf16.mxu1 %v2866_v10  ;;  %v3326_v10 = vld [vmem:[#allocation69_spill] sm:$0xff] }
 0x3dc   :  { %1619 = vmatpush1.bf16.msra.mxu1 %v2869_v36  ;;  %v3325_v36 = vld [vmem:[#allocation68_spill] sm:$0xff] }
 0x3df   :  { %1621 = vmatmul.mubr.bf16.vlgmr.msra.gmra.mrb[8].mxu1 %v1463_v26 }
 0x4b2   :  { %v1622_v28 = vpop.f32.mrb[8].mxu1 }
 0x4b3   :  { %v1952_v27 = vadd.f32 %v1622_v28, %v2919_v21  ;;  %v1624_v30 = vpop.f32.mrb[9].mxu1  ;;  %v3327_v21 = vld [vmem:[#allocation70_spill] sm:$0xff] }
 0x4b4   :  { %v1953_v8 = vadd.f32 %v1624_v30, %v2921_v22  ;;  %v1626_v33 = vpop.f32.mrb[10].mxu1 }
 0x4b5   :  { %v1629_v6 = vmax.f32 %v1952_v27, 0.0  ;;  %v1627_v17 = vpop.f32.mrb[11].mxu1 }
 0x4b6   :  { %v1630_v4 = vmax.f32 %v1953_v8, 0.0 }
 0x4b7   :  { %v1631_v40 = vpack.c.bf16 %v1629_v6, %v1629_v6 }
 0x4b8   :  { %v1632_v29 = vpack.c.bf16 %v1630_v4, %v1630_v4 }
 0x4ba   :  { %1665 = vmatprep.mubr.bf16.mxu0 %v1632_v29 }
 0x4bb   :  { %1666 = vmatmul.mubr.bf16.vlgmr.msra.gmra.mrb[4].mxu0 %v1631_v40 }
 0x4bc   :  { %1929 = vmatpush3.bf16.msra.mxu0 %v2925_v32 }
 0x4bd   :  { %1930 = vmatprep.subr.bf16.mxu0 %v2927_v34 }
 0x4c0   :  { %1931 = vmatpush3.bf16.msra.mxu0 %v2930_v35 }
 0x4c1   :  { %1932 = vmatprep.subr.bf16.mxu0 %v2933_v38 }
 0x4c4   :  { %1933 = vmatpush3.bf16.msra.mxu0 %v2936_v39 }
 0x4c5   :  { %1934 = vmatprep.subr.bf16.mxu0 %v2939_v9 }
 0x4c8   :  { %1935 = vmatpush3.bf16.msra.mxu0 %v2942_v11 }
 0x4c9   :  { %1936 = vmatprep.subr.bf16.mxu0 %v2945_v7 }
 0x4cc   :  { %1937 = vmatpush3.bf16.msra.mxu0 %v2948_v2 }
 0x4cd   :  { %1938 = vmatprep.subr.bf16.mxu0 %v2951_v13 }
 0x4d0   :  { %1939 = vmatpush3.bf16.msra.mxu0 %v2954_v14 }
 0x4d1   :  { %1940 = vmatprep.subr.bf16.mxu0 %v2958_v12 }
 0x4d4   :  { %1941 = vmatpush3.bf16.msra.mxu0 %v3325_v36 }
 0x4d5   :  { %1942 = vmatprep.subr.bf16.mxu0 %v3326_v10 }
 0x4d8   :  { %1943 = vmatpush3.bf16.msra.mxu0 %v3327_v21 }
 0x58e   :  { %v1667_v22 = vpop.f32.mrb[4].mxu0 }
 0x58f   :  { %v1668_v32 = vadd.f32 %v1667_v22, %v2973_v24  ;;  %v1669_v34 = vpop.f32.mrb[5].mxu0 }
 0x590   :  { %v1670_v35 = vadd.f32 %v1669_v34, %v2975_v25  ;;  %v1671_v38 = vpop.f32.mrb[6].mxu0 }
 0x591   :  { %v1674_v39 = vmax.f32 %v1668_v32, 0.0  ;;  %v1672_v9 = vpop.f32.mrb[7].mxu0 }
 0x592   :  { %v1675_v11 = vmax.f32 %v1670_v35, 0.0 }
 0x593   :  { %v1676_v2 = vpack.c.bf16 %v1674_v39, %v1674_v39 }
 0x594   :  { %v1677_v7 = vpack.c.bf16 %v1675_v11, %v1675_v11 }
 0x596   :  { %1710 = vmatprep.mubr.bf16.mxu0 %v1677_v7 }
 0x597   :  { %1711 = vmatmul.mubr.bf16.vlgmr.msra.gmra.mrb[8].mxu0 %v1676_v2 }
 0x66a   :  { %v1944_v13 = vpop.f32.mrb[8].mxu0 }
 0x66b   :  { %v1945_v14 = vpop.f32.mrb[9].mxu0 }
 0x66c   :  { %v1946_v12 = vadd.f32 %v1945_v14, %v1944_v13  ;;  %v1947_v41 = vpop.f32.mrb[10].mxu0 }
 0x66d   :  { %v1948_v42 = vpop.f32.mrb[11].mxu0 }
 0x66e   :  { %v1713_v43 = vadd.f32 %v1946_v12, %v3076_v3 }
 0x670   :  { %1718 = vst [vmem:[%s3138_s9] sm:$0xff] %v1713_v43 }
 0x671   :  { %1727 = vsyncpa [#allocation3], 1 }
 0x672   :  { %1728 = vsyncpa [#allocation5], 1 }

</bundles_post_ra>
